<compile_context>
chip_gen: v5e
topology: v5e:2x2
jax: 0.10.0
libtpu: 0.0.40
codegen_flags: <defaults>
</compile_context>

<pallas_src>
import jax
import jax.numpy as jnp
from jax import lax
from jax.experimental import pallas as pl
from jax.experimental.pallas import tpu as pltpu


def _round_up(x, m):
    return (x + m - 1) // m * m


def _make_fused_kernel(K, M1, M2, M3):
    """conv1(stride 2, streamed taps)+ReLU -> conv2+ReLU -> conv3, batch-folded."""

    def kernel(xt_ref, w1_ref, b1_ref, w2_ref, b2_ref, w3_ref, b3_ref,
               o_ref, acc1_ref):
        t = pl.program_id(0)

        @pl.when(t == 0)
        def _init():
            acc1_ref[...] = jnp.zeros_like(acc1_ref)

        # conv1, tap t: ONE MXU dot over the batch-folded M axis, accumulated
        # in f32 VMEM scratch.  xt_ref / w1_ref are per-tap blocks streamed by
        # the grid, so the DMA for tap t+1 overlaps this dot.
        acc1_ref[...] += jnp.dot(xt_ref[0], w1_ref[0],
                                 preferred_element_type=jnp.float32)

        @pl.when(t == K - 1)
        def _epilogue():
            # conv1 epilogue: bias + ReLU, one f32 pass over the folded batch.
            h1 = jnp.maximum(acc1_ref[...] + b1_ref[...], 0.0).astype(jnp.bfloat16)

            # conv2 (stride 1) + ReLU.  K is small & static -> unrolled dots.
            C2 = w2_ref.shape[2]
            acc2 = jnp.zeros((M2, C2), jnp.float32)
            for k in range(K):
                acc2 = acc2 + jnp.dot(h1[k:k + M2, :], w2_ref[k],
                                      preferred_element_type=jnp.float32)
            h2 = jnp.maximum(acc2 + b2_ref[...], 0.0).astype(jnp.bfloat16)

            # conv3 (stride 1), no ReLU.
            C3 = w3_ref.shape[2]
            acc3 = jnp.zeros((M3, C3), jnp.float32)
            for k in range(K):
                acc3 = acc3 + jnp.dot(h2[k:k + M3, :], w3_ref[k],
                                      preferred_element_type=jnp.float32)

            # Plain (M3, C3) store: valid rows are extracted / transposed /
            # flattened by the wrapper (192 floats), no in-kernel transpose.
            o_ref[...] = acc3 + b3_ref[...]

    return kernel


def init_wavenet_params(key, feature_dim):
    """PyTorch-style uniform init.  Weights are pre-cast to bf16 ONCE here
    (matmul-input precision used by both kernel and reference); biases stay f32."""
    c1 = (feature_dim - 32) // 2
    c2 = (feature_dim - 128) // 4
    c3 = (feature_dim - 256) // 8
    K = 8
    specs = [(feature_dim, c1), (c1, c2), (c2, c3)]
    params = []
    for (cin, cout) in specs:
        key, kw, kb = jax.random.split(key, 3)
        bound = 1.0 / jnp.sqrt(cin * K)
        w = jax.random.uniform(kw, (K, cin, cout), jnp.float32, -bound, bound)
        bias = jax.random.uniform(kb, (1, cout), jnp.float32, -bound, bound)
        params.append((w.astype(jnp.bfloat16), bias))   # (K, C_in, C_out) bf16
    return params


@jax.jit
def wavenet_forward(x_ncl, params):
    """x_ncl: (B, feature_dim, L) in PyTorch NCL layout -> (B, c3 * L3)."""
    (w1, b1), (w2, b2), (w3, b3) = params
    B, C_in, L = x_ncl.shape
    K = w1.shape[0]
    C1, C2, C3 = w1.shape[2], w2.shape[2], w3.shape[2]
    L1 = (L - K) // 2 + 1
    L2 = L1 - K + 1
    L3 = L2 - K + 1

    # Batch-folded M blocks: each batch occupies a P-row (multiple of 8) block.
    P = _round_up(max(L1, 8), 8)
    M3 = B * P            # conv3 output rows (valid rows: [b*P, b*P+L3))
    M2 = M3 + 8           # conv2 output rows (>= M3 + K - 1)
    M1 = M2 + 8           # conv1 output rows (>= M2 + K - 1)

    # Pre-shifted, batch-folded per-tap slabs for the stride-2 conv1:
    #   x_taps[k, b*P + i, :] = x[b, :, 2*i + k]   for i < L1, zeros elsewhere.
    # Handles odd L correctly (slices never run past the sequence end).
    x_nlc = jnp.transpose(x_ncl, (0, 2, 1)).astype(jnp.bfloat16)   # (B, L, C_in)
    taps = []
    for k in range(K):
        tk = x_nlc[:, k:k + 2 * L1 - 1:2, :]                       # (B, L1, C_in)
        tk = jnp.pad(tk, ((0, 0), (0, P - L1), (0, 0)))            # (B, P,  C_in)
        tk = tk.reshape(B * P, C_in)
        tk = jnp.pad(tk, ((0, M1 - B * P), (0, 0)))                # (M1, C_in)
        taps.append(tk)
    x_taps = jnp.stack(taps, axis=0)                               # (K, M1, C_in)

    flops = 2 * K * (M1 * C_in * C1 + M2 * C1 * C2 + M3 * C2 * C3)
    bytes_accessed = ((x_taps.size + w1.size + w2.size + w3.size) * 2
                      + (b1.size + b2.size + b3.size) * 4
                      + M3 * C3 * 4)
    vmem_bytes = (2 * M1 * C_in * 2          # x_taps blocks (double-buffered)
                  + 2 * C_in * C1 * 2        # w1 blocks (double-buffered)
                  + (w2.size + w3.size) * 2
                  + (b1.size + b2.size + b3.size) * 4
                  + M3 * C3 * 4              # output block
                  + M1 * C1 * 4)             # conv1 accumulator scratch
    vmem_limit = int(min(max(4 * vmem_bytes, 8 * 1024 * 1024), 32 * 1024 * 1024))

    grid_spec = pltpu.PrefetchScalarGridSpec(
        num_scalar_prefetch=0,
        grid=(K,),                                             # one step per conv1 tap
        in_specs=[
            pl.BlockSpec((1, M1, C_in), lambda t: (t, 0, 0)),  # x_taps: streamed per tap
            pl.BlockSpec((1, C_in, C1), lambda t: (t, 0, 0)),  # w1:     streamed per tap
            pl.BlockSpec((1, C1), lambda t: (0, 0)),           # b1 (resident)
            pl.BlockSpec((K, C1, C2), lambda t: (0, 0, 0)),    # w2 (resident)
            pl.BlockSpec((1, C2), lambda t: (0, 0)),           # b2 (resident)
            pl.BlockSpec((K, C2, C3), lambda t: (0, 0, 0)),    # w3 (resident)
            pl.BlockSpec((1, C3), lambda t: (0, 0)),           # b3 (resident)
        ],
        out_specs=pl.BlockSpec((M3, C3), lambda t: (0, 0)),    # written in last step
        scratch_shapes=[pltpu.VMEM((M1, C1), jnp.float32)],    # conv1 accumulator
    )

    out = pl.pallas_call(
        _make_fused_kernel(K, M1, M2, M3),
        out_shape=jax.ShapeDtypeStruct((M3, C3), jnp.float32),
        grid_spec=grid_spec,
        compiler_params=pltpu.CompilerParams(
            dimension_semantics=("arbitrary",),
            vmem_limit_bytes=vmem_limit),
        cost_estimate=pl.CostEstimate(flops=flops, transcendentals=0,
                                      bytes_accessed=bytes_accessed),
    )(x_taps, w1, b1, w2, b2, w3, b3)

    # Extract valid rows, then the tiny (B, L3, C3) -> (B, C3, L3) transpose +
    # flatten (torch.flatten(x, 1) parity) fuses into the reshape.
    y = out.reshape(B, P, C3)[:, :L3, :]
    return jnp.transpose(y, (0, 2, 1)).reshape(B, C3 * L3)


def _reference_forward(x_ncl, params):
    """Pure-JAX reference with the SAME numerics (bf16 matmul inputs, f32 acc)."""
    def conv(x, w_kic, b, stride):
        w_oik = jnp.transpose(w_kic, (2, 1, 0))            # (O, I, K), already bf16
        y = lax.conv_general_dilated(
            x.astype(jnp.bfloat16), w_oik, window_strides=(stride,),
            padding="VALID", dimension_numbers=("NCH", "OIH", "NCH"),
            preferred_element_type=jnp.float32)
        return y + b[0][None, :, None]

    (w1, b1), (w2, b2), (w3, b3) = params
    h = jax.nn.relu(conv(x_ncl, w1, b1, 2))
    h = jax.nn.relu(conv(h, w2, b2, 1))
    y = conv(h, w3, b3, 1)
    return y.reshape(y.shape[0], -1)


if __name__ == "__main__":
    # Small config consistent with the module's arithmetic (feature_dim > 256).
    feature_dim = 320          # -> channels 144, 48, 8
    B, L = 2, 40               # -> lengths 17, 10, 3 ; output (2, 8*3) = (2, 24)

    key = jax.random.PRNGKey(0)
    key, kx = jax.random.split(key)
    x = jax.random.normal(kx, (B, feature_dim, L), jnp.float32)
    params = init_wavenet_params(key, feature_dim)

    out = jax.block_until_ready(wavenet_forward(x, params))
    ref = jax.block_until_ready(_reference_forward(x, params))

    assert out.shape == (B, ((feature_dim - 256) // 8) * 3), out.shape
    max_err = float(jnp.max(jnp.abs(out - ref)))
    assert jnp.allclose(out, ref, rtol=1e-3, atol=1e-3), max_err

    print("KERNEL_OK")
</pallas_src>

<mosaic_0001>
module attributes {stable_mosaic.version = 11 : i64} {
  func.func @kernel(%arg0: i32, %arg1: memref<1x64x320xbf16, #tpu.memory_space<vmem>>, %arg2: memref<1x320x144xbf16, #tpu.memory_space<vmem>>, %arg3: memref<1x144xf32, #tpu.memory_space<vmem>>, %arg4: memref<8x144x48xbf16, #tpu.memory_space<vmem>>, %arg5: memref<1x48xf32, #tpu.memory_space<vmem>>, %arg6: memref<8x48x8xbf16, #tpu.memory_space<vmem>>, %arg7: memref<1x8xf32, #tpu.memory_space<vmem>>, %arg8: memref<48x8xf32, #tpu.memory_space<vmem>>, %arg9: memref<64x144xf32, #tpu.memory_space<vmem>>) attributes {dimension_semantics = [#tpu.dimension_semantics<arbitrary>], iteration_bounds = array<i64: 8>, scalar_prefetch = 0 : i64, scratch_operands = 1 : i64, tpu.core_type = #tpu.core_type<tc>, window_params = [{transform_indices = @transform_0, window_bounds = array<i64: 1, 64, 320>}, {transform_indices = @transform_1, window_bounds = array<i64: 1, 320, 144>}, {pipeline_mode = #tpu.pipeline_mode<synchronous>, transform_indices = @transform_2, window_bounds = array<i64: 1, 144>}, {pipeline_mode = #tpu.pipeline_mode<synchronous>, transform_indices = @transform_3, window_bounds = array<i64: 8, 144, 48>}, {pipeline_mode = #tpu.pipeline_mode<synchronous>, transform_indices = @transform_4, window_bounds = array<i64: 1, 48>}, {pipeline_mode = #tpu.pipeline_mode<synchronous>, transform_indices = @transform_5, window_bounds = array<i64: 8, 48, 8>}, {pipeline_mode = #tpu.pipeline_mode<synchronous>, transform_indices = @transform_6, window_bounds = array<i64: 1, 8>}, {pipeline_mode = #tpu.pipeline_mode<synchronous>, transform_indices = @transform_7, window_bounds = array<i64: 48, 8>}]} {
    %c0_i32 = arith.constant 0 : i32
    %0 = arith.cmpi eq, %arg0, %c0_i32 : i32
    %1 = arith.extui %0 : i1 to i32
    %c0_i32_0 = arith.constant 0 : i32
    %2 = arith.cmpi ne, %1, %c0_i32_0 : i32
    scf.if %2 {
      %cst_11 = arith.constant 0.000000e+00 : f32
      %14 = vector.broadcast %cst_11 : f32 to vector<64x144xf32>
      %c0_12 = arith.constant 0 : index
      %c0_13 = arith.constant 0 : index
      %15 = vector.load %arg9[%c0_12, %c0_13] : memref<64x144xf32, #tpu.memory_space<vmem>>, vector<64x144xf32>
      tpu.vector_store %arg9[%c0_12, %c0_13], %14 {strides = array<i32>} : memref<64x144xf32, #tpu.memory_space<vmem>>, vector<64x144xf32>,
    } else {
    }
    %c0 = arith.constant 0 : index
    %c0_1 = arith.constant 0 : index
    %3 = vector.load %arg9[%c0, %c0_1] : memref<64x144xf32, #tpu.memory_space<vmem>>, vector<64x144xf32>
    %c0_2 = arith.constant 0 : index
    %c0_3 = arith.constant 0 : index
    %c0_4 = arith.constant 0 : index
    %4 = vector.load %arg1[%c0_2, %c0_3, %c0_4] : memref<1x64x320xbf16, #tpu.memory_space<vmem>>, vector<1x64x320xbf16>
    %5 = vector.shape_cast %4 : vector<1x64x320xbf16> to vector<64x320xbf16>
    %c0_5 = arith.constant 0 : index
    %c0_6 = arith.constant 0 : index
    %c0_7 = arith.constant 0 : index
    %6 = vector.load %arg2[%c0_5, %c0_6, %c0_7] : memref<1x320x144xbf16, #tpu.memory_space<vmem>>, vector<1x320x144xbf16>
    %7 = vector.shape_cast %6 : vector<1x320x144xbf16> to vector<320x144xbf16>
    %cst = arith.constant dense<0.000000e+00> : vector<64x144xf32>
    %8 = tpu.matmul %5, %7, %cst {dimension_numbers = #tpu.dot_dimension_numbers<[1], [0], [0], [1], [0, 0, 1, 1], [], []>} : vector<64x320xbf16>, vector<320x144xbf16>, vector<64x144xf32> -> vector<64x144xf32>
    %9 = arith.addf %3, %8 : vector<64x144xf32>
    %c0_8 = arith.constant 0 : index
    %c0_9 = arith.constant 0 : index
    %10 = vector.load %arg9[%c0_8, %c0_9] : memref<64x144xf32, #tpu.memory_space<vmem>>, vector<64x144xf32>
    tpu.vector_store %arg9[%c0_8, %c0_9], %9 {strides = array<i32>} : memref<64x144xf32, #tpu.memory_space<vmem>>, vector<64x144xf32>,
    %c7_i32 = arith.constant 7 : i32
    %11 = arith.cmpi eq, %arg0, %c7_i32 : i32
    %12 = arith.extui %11 : i1 to i32
    %c0_i32_10 = arith.constant 0 : i32
    %13 = arith.cmpi ne, %12, %c0_i32_10 : i32
    scf.if %13 {
      %c0_11 = arith.constant 0 : index
      %c0_12 = arith.constant 0 : index
      %14 = vector.load %arg9[%c0_11, %c0_12] : memref<64x144xf32, #tpu.memory_space<vmem>>, vector<64x144xf32>
      %c0_13 = arith.constant 0 : index
      %c0_14 = arith.constant 0 : index
      %15 = vector.load %arg3[%c0_13, %c0_14] : memref<1x144xf32, #tpu.memory_space<vmem>>, vector<1x144xf32>
      %16 = vector.broadcast %15 : vector<1x144xf32> to vector<64x144xf32>
      %17 = arith.addf %14, %16 : vector<64x144xf32>
      %cst_15 = arith.constant 0.000000e+00 : f32
      %18 = vector.broadcast %cst_15 : f32 to vector<64x144xf32>
      %19 = arith.maximumf %17, %18 : vector<64x144xf32>
      %20 = arith.truncf %19 : vector<64x144xf32> to vector<64x144xbf16>
      %cst_16 = arith.constant 0.000000e+00 : f32
      %21 = vector.broadcast %cst_16 : f32 to vector<56x48xf32>
      %22 = vector.extract_strided_slice %20 {offsets = [0, 0], sizes = [56, 144], strides = [1, 1]} : vector<64x144xbf16> to vector<56x144xbf16>
      %c0_17 = arith.constant 0 : index
      %c0_18 = arith.constant 0 : index
      %c0_19 = arith.constant 0 : index
      %23 = vector.load %arg4[%c0_17, %c0_18, %c0_19] : memref<8x144x48xbf16, #tpu.memory_space<vmem>>, vector<1x144x48xbf16>
      %24 = vector.shape_cast %23 : vector<1x144x48xbf16> to vector<144x48xbf16>
      %cst_20 = arith.constant dense<0.000000e+00> : vector<56x48xf32>
      %25 = tpu.matmul %22, %24, %cst_20 {dimension_numbers = #tpu.dot_dimension_numbers<[1], [0], [0], [1], [0, 0, 1, 1], [], []>} : vector<56x144xbf16>, vector<144x48xbf16>, vector<56x48xf32> -> vector<56x48xf32>
      %26 = arith.addf %21, %25 : vector<56x48xf32>
      %27 = vector.extract_strided_slice %20 {offsets = [1, 0], sizes = [56, 144], strides = [1, 1]} : vector<64x144xbf16> to vector<56x144xbf16>
      %c1 = arith.constant 1 : index
      %c0_21 = arith.constant 0 : index
      %c0_22 = arith.constant 0 : index
      %28 = vector.load %arg4[%c1, %c0_21, %c0_22] : memref<8x144x48xbf16, #tpu.memory_space<vmem>>, vector<1x144x48xbf16>
      %29 = vector.shape_cast %28 : vector<1x144x48xbf16> to vector<144x48xbf16>
      %cst_23 = arith.constant dense<0.000000e+00> : vector<56x48xf32>
      %30 = tpu.matmul %27, %29, %cst_23 {dimension_numbers = #tpu.dot_dimension_numbers<[1], [0], [0], [1], [0, 0, 1, 1], [], []>} : vector<56x144xbf16>, vector<144x48xbf16>, vector<56x48xf32> -> vector<56x48xf32>
      %31 = arith.addf %26, %30 : vector<56x48xf32>
      %32 = vector.extract_strided_slice %20 {offsets = [2, 0], sizes = [56, 144], strides = [1, 1]} : vector<64x144xbf16> to vector<56x144xbf16>
      %c2 = arith.constant 2 : index
      %c0_24 = arith.constant 0 : index
      %c0_25 = arith.constant 0 : index
      %33 = vector.load %arg4[%c2, %c0_24, %c0_25] : memref<8x144x48xbf16, #tpu.memory_space<vmem>>, vector<1x144x48xbf16>
      %34 = vector.shape_cast %33 : vector<1x144x48xbf16> to vector<144x48xbf16>
      %cst_26 = arith.constant dense<0.000000e+00> : vector<56x48xf32>
      %35 = tpu.matmul %32, %34, %cst_26 {dimension_numbers = #tpu.dot_dimension_numbers<[1], [0], [0], [1], [0, 0, 1, 1], [], []>} : vector<56x144xbf16>, vector<144x48xbf16>, vector<56x48xf32> -> vector<56x48xf32>
      %36 = arith.addf %31, %35 : vector<56x48xf32>
      %37 = vector.extract_strided_slice %20 {offsets = [3, 0], sizes = [56, 144], strides = [1, 1]} : vector<64x144xbf16> to vector<56x144xbf16>
      %c3 = arith.constant 3 : index
      %c0_27 = arith.constant 0 : index
      %c0_28 = arith.constant 0 : index
      %38 = vector.load %arg4[%c3, %c0_27, %c0_28] : memref<8x144x48xbf16, #tpu.memory_space<vmem>>, vector<1x144x48xbf16>
      %39 = vector.shape_cast %38 : vector<1x144x48xbf16> to vector<144x48xbf16>
      %cst_29 = arith.constant dense<0.000000e+00> : vector<56x48xf32>
      %40 = tpu.matmul %37, %39, %cst_29 {dimension_numbers = #tpu.dot_dimension_numbers<[1], [0], [0], [1], [0, 0, 1, 1], [], []>} : vector<56x144xbf16>, vector<144x48xbf16>, vector<56x48xf32> -> vector<56x48xf32>
      %41 = arith.addf %36, %40 : vector<56x48xf32>
      %42 = vector.extract_strided_slice %20 {offsets = [4, 0], sizes = [56, 144], strides = [1, 1]} : vector<64x144xbf16> to vector<56x144xbf16>
      %c4 = arith.constant 4 : index
      %c0_30 = arith.constant 0 : index
      %c0_31 = arith.constant 0 : index
      %43 = vector.load %arg4[%c4, %c0_30, %c0_31] : memref<8x144x48xbf16, #tpu.memory_space<vmem>>, vector<1x144x48xbf16>
      %44 = vector.shape_cast %43 : vector<1x144x48xbf16> to vector<144x48xbf16>
      %cst_32 = arith.constant dense<0.000000e+00> : vector<56x48xf32>
      %45 = tpu.matmul %42, %44, %cst_32 {dimension_numbers = #tpu.dot_dimension_numbers<[1], [0], [0], [1], [0, 0, 1, 1], [], []>} : vector<56x144xbf16>, vector<144x48xbf16>, vector<56x48xf32> -> vector<56x48xf32>
      %46 = arith.addf %41, %45 : vector<56x48xf32>
      %47 = vector.extract_strided_slice %20 {offsets = [5, 0], sizes = [56, 144], strides = [1, 1]} : vector<64x144xbf16> to vector<56x144xbf16>
      %c5 = arith.constant 5 : index
      %c0_33 = arith.constant 0 : index
      %c0_34 = arith.constant 0 : index
      %48 = vector.load %arg4[%c5, %c0_33, %c0_34] : memref<8x144x48xbf16, #tpu.memory_space<vmem>>, vector<1x144x48xbf16>
      %49 = vector.shape_cast %48 : vector<1x144x48xbf16> to vector<144x48xbf16>
      %cst_35 = arith.constant dense<0.000000e+00> : vector<56x48xf32>
      %50 = tpu.matmul %47, %49, %cst_35 {dimension_numbers = #tpu.dot_dimension_numbers<[1], [0], [0], [1], [0, 0, 1, 1], [], []>} : vector<56x144xbf16>, vector<144x48xbf16>, vector<56x48xf32> -> vector<56x48xf32>
      %51 = arith.addf %46, %50 : vector<56x48xf32>
      %52 = vector.extract_strided_slice %20 {offsets = [6, 0], sizes = [56, 144], strides = [1, 1]} : vector<64x144xbf16> to vector<56x144xbf16>
      %c6 = arith.constant 6 : index
      %c0_36 = arith.constant 0 : index
      %c0_37 = arith.constant 0 : index
      %53 = vector.load %arg4[%c6, %c0_36, %c0_37] : memref<8x144x48xbf16, #tpu.memory_space<vmem>>, vector<1x144x48xbf16>
      %54 = vector.shape_cast %53 : vector<1x144x48xbf16> to vector<144x48xbf16>
      %cst_38 = arith.constant dense<0.000000e+00> : vector<56x48xf32>
      %55 = tpu.matmul %52, %54, %cst_38 {dimension_numbers = #tpu.dot_dimension_numbers<[1], [0], [0], [1], [0, 0, 1, 1], [], []>} : vector<56x144xbf16>, vector<144x48xbf16>, vector<56x48xf32> -> vector<56x48xf32>
      %56 = arith.addf %51, %55 : vector<56x48xf32>
      %57 = vector.extract_strided_slice %20 {offsets = [7, 0], sizes = [56, 144], strides = [1, 1]} : vector<64x144xbf16> to vector<56x144xbf16>
      %c7 = arith.constant 7 : index
      %c0_39 = arith.constant 0 : index
      %c0_40 = arith.constant 0 : index
      %58 = vector.load %arg4[%c7, %c0_39, %c0_40] : memref<8x144x48xbf16, #tpu.memory_space<vmem>>, vector<1x144x48xbf16>
      %59 = vector.shape_cast %58 : vector<1x144x48xbf16> to vector<144x48xbf16>
      %cst_41 = arith.constant dense<0.000000e+00> : vector<56x48xf32>
      %60 = tpu.matmul %57, %59, %cst_41 {dimension_numbers = #tpu.dot_dimension_numbers<[1], [0], [0], [1], [0, 0, 1, 1], [], []>} : vector<56x144xbf16>, vector<144x48xbf16>, vector<56x48xf32> -> vector<56x48xf32>
      %61 = arith.addf %56, %60 : vector<56x48xf32>
      %c0_42 = arith.constant 0 : index
      %c0_43 = arith.constant 0 : index
      %62 = vector.load %arg5[%c0_42, %c0_43] : memref<1x48xf32, #tpu.memory_space<vmem>>, vector<1x48xf32>
      %63 = vector.broadcast %62 : vector<1x48xf32> to vector<56x48xf32>
      %64 = arith.addf %61, %63 : vector<56x48xf32>
      %cst_44 = arith.constant 0.000000e+00 : f32
      %65 = vector.broadcast %cst_44 : f32 to vector<56x48xf32>
      %66 = arith.maximumf %64, %65 : vector<56x48xf32>
      %67 = arith.truncf %66 : vector<56x48xf32> to vector<56x48xbf16>
      %cst_45 = arith.constant 0.000000e+00 : f32
      %68 = vector.broadcast %cst_45 : f32 to vector<48x8xf32>
      %69 = vector.extract_strided_slice %67 {offsets = [0, 0], sizes = [48, 48], strides = [1, 1]} : vector<56x48xbf16> to vector<48x48xbf16>
      %c0_46 = arith.constant 0 : index
      %c0_47 = arith.constant 0 : index
      %c0_48 = arith.constant 0 : index
      %70 = vector.load %arg6[%c0_46, %c0_47, %c0_48] : memref<8x48x8xbf16, #tpu.memory_space<vmem>>, vector<1x48x8xbf16>
      %71 = vector.shape_cast %70 : vector<1x48x8xbf16> to vector<48x8xbf16>
      %cst_49 = arith.constant dense<0.000000e+00> : vector<48x8xf32>
      %72 = tpu.matmul %69, %71, %cst_49 {dimension_numbers = #tpu.dot_dimension_numbers<[1], [0], [0], [1], [0, 0, 1, 1], [], []>} : vector<48x48xbf16>, vector<48x8xbf16>, vector<48x8xf32> -> vector<48x8xf32>
      %73 = arith.addf %68, %72 : vector<48x8xf32>
      %74 = vector.extract_strided_slice %67 {offsets = [1, 0], sizes = [48, 48], strides = [1, 1]} : vector<56x48xbf16> to vector<48x48xbf16>
      %c1_50 = arith.constant 1 : index
      %c0_51 = arith.constant 0 : index
      %c0_52 = arith.constant 0 : index
      %75 = vector.load %arg6[%c1_50, %c0_51, %c0_52] : memref<8x48x8xbf16, #tpu.memory_space<vmem>>, vector<1x48x8xbf16>
      %76 = vector.shape_cast %75 : vector<1x48x8xbf16> to vector<48x8xbf16>
      %cst_53 = arith.constant dense<0.000000e+00> : vector<48x8xf32>
      %77 = tpu.matmul %74, %76, %cst_53 {dimension_numbers = #tpu.dot_dimension_numbers<[1], [0], [0], [1], [0, 0, 1, 1], [], []>} : vector<48x48xbf16>, vector<48x8xbf16>, vector<48x8xf32> -> vector<48x8xf32>
      %78 = arith.addf %73, %77 : vector<48x8xf32>
      %79 = vector.extract_strided_slice %67 {offsets = [2, 0], sizes = [48, 48], strides = [1, 1]} : vector<56x48xbf16> to vector<48x48xbf16>
      %c2_54 = arith.constant 2 : index
      %c0_55 = arith.constant 0 : index
      %c0_56 = arith.constant 0 : index
      %80 = vector.load %arg6[%c2_54, %c0_55, %c0_56] : memref<8x48x8xbf16, #tpu.memory_space<vmem>>, vector<1x48x8xbf16>
      %81 = vector.shape_cast %80 : vector<1x48x8xbf16> to vector<48x8xbf16>
      %cst_57 = arith.constant dense<0.000000e+00> : vector<48x8xf32>
      %82 = tpu.matmul %79, %81, %cst_57 {dimension_numbers = #tpu.dot_dimension_numbers<[1], [0], [0], [1], [0, 0, 1, 1], [], []>} : vector<48x48xbf16>, vector<48x8xbf16>, vector<48x8xf32> -> vector<48x8xf32>
      %83 = arith.addf %78, %82 : vector<48x8xf32>
      %84 = vector.extract_strided_slice %67 {offsets = [3, 0], sizes = [48, 48], strides = [1, 1]} : vector<56x48xbf16> to vector<48x48xbf16>
      %c3_58 = arith.constant 3 : index
      %c0_59 = arith.constant 0 : index
      %c0_60 = arith.constant 0 : index
      %85 = vector.load %arg6[%c3_58, %c0_59, %c0_60] : memref<8x48x8xbf16, #tpu.memory_space<vmem>>, vector<1x48x8xbf16>
      %86 = vector.shape_cast %85 : vector<1x48x8xbf16> to vector<48x8xbf16>
      %cst_61 = arith.constant dense<0.000000e+00> : vector<48x8xf32>
      %87 = tpu.matmul %84, %86, %cst_61 {dimension_numbers = #tpu.dot_dimension_numbers<[1], [0], [0], [1], [0, 0, 1, 1], [], []>} : vector<48x48xbf16>, vector<48x8xbf16>, vector<48x8xf32> -> vector<48x8xf32>
      %88 = arith.addf %83, %87 : vector<48x8xf32>
      %89 = vector.extract_strided_slice %67 {offsets = [4, 0], sizes = [48, 48], strides = [1, 1]} : vector<56x48xbf16> to vector<48x48xbf16>
      %c4_62 = arith.constant 4 : index
      %c0_63 = arith.constant 0 : index
      %c0_64 = arith.constant 0 : index
      %90 = vector.load %arg6[%c4_62, %c0_63, %c0_64] : memref<8x48x8xbf16, #tpu.memory_space<vmem>>, vector<1x48x8xbf16>
      %91 = vector.shape_cast %90 : vector<1x48x8xbf16> to vector<48x8xbf16>
      %cst_65 = arith.constant dense<0.000000e+00> : vector<48x8xf32>
      %92 = tpu.matmul %89, %91, %cst_65 {dimension_numbers = #tpu.dot_dimension_numbers<[1], [0], [0], [1], [0, 0, 1, 1], [], []>} : vector<48x48xbf16>, vector<48x8xbf16>, vector<48x8xf32> -> vector<48x8xf32>
      %93 = arith.addf %88, %92 : vector<48x8xf32>
      %94 = vector.extract_strided_slice %67 {offsets = [5, 0], sizes = [48, 48], strides = [1, 1]} : vector<56x48xbf16> to vector<48x48xbf16>
      %c5_66 = arith.constant 5 : index
      %c0_67 = arith.constant 0 : index
      %c0_68 = arith.constant 0 : index
      %95 = vector.load %arg6[%c5_66, %c0_67, %c0_68] : memref<8x48x8xbf16, #tpu.memory_space<vmem>>, vector<1x48x8xbf16>
      %96 = vector.shape_cast %95 : vector<1x48x8xbf16> to vector<48x8xbf16>
      %cst_69 = arith.constant dense<0.000000e+00> : vector<48x8xf32>
      %97 = tpu.matmul %94, %96, %cst_69 {dimension_numbers = #tpu.dot_dimension_numbers<[1], [0], [0], [1], [0, 0, 1, 1], [], []>} : vector<48x48xbf16>, vector<48x8xbf16>, vector<48x8xf32> -> vector<48x8xf32>
      %98 = arith.addf %93, %97 : vector<48x8xf32>
      %99 = vector.extract_strided_slice %67 {offsets = [6, 0], sizes = [48, 48], strides = [1, 1]} : vector<56x48xbf16> to vector<48x48xbf16>
      %c6_70 = arith.constant 6 : index
      %c0_71 = arith.constant 0 : index
      %c0_72 = arith.constant 0 : index
      %100 = vector.load %arg6[%c6_70, %c0_71, %c0_72] : memref<8x48x8xbf16, #tpu.memory_space<vmem>>, vector<1x48x8xbf16>
      %101 = vector.shape_cast %100 : vector<1x48x8xbf16> to vector<48x8xbf16>
      %cst_73 = arith.constant dense<0.000000e+00> : vector<48x8xf32>
      %102 = tpu.matmul %99, %101, %cst_73 {dimension_numbers = #tpu.dot_dimension_numbers<[1], [0], [0], [1], [0, 0, 1, 1], [], []>} : vector<48x48xbf16>, vector<48x8xbf16>, vector<48x8xf32> -> vector<48x8xf32>
      %103 = arith.addf %98, %102 : vector<48x8xf32>
      %104 = vector.extract_strided_slice %67 {offsets = [7, 0], sizes = [48, 48], strides = [1, 1]} : vector<56x48xbf16> to vector<48x48xbf16>
      %c7_74 = arith.constant 7 : index
      %c0_75 = arith.constant 0 : index
      %c0_76 = arith.constant 0 : index
      %105 = vector.load %arg6[%c7_74, %c0_75, %c0_76] : memref<8x48x8xbf16, #tpu.memory_space<vmem>>, vector<1x48x8xbf16>
      %106 = vector.shape_cast %105 : vector<1x48x8xbf16> to vector<48x8xbf16>
      %cst_77 = arith.constant dense<0.000000e+00> : vector<48x8xf32>
      %107 = tpu.matmul %104, %106, %cst_77 {dimension_numbers = #tpu.dot_dimension_numbers<[1], [0], [0], [1], [0, 0, 1, 1], [], []>} : vector<48x48xbf16>, vector<48x8xbf16>, vector<48x8xf32> -> vector<48x8xf32>
      %108 = arith.addf %103, %107 : vector<48x8xf32>
      %c0_78 = arith.constant 0 : index
      %c0_79 = arith.constant 0 : index
      %109 = vector.load %arg7[%c0_78, %c0_79] : memref<1x8xf32, #tpu.memory_space<vmem>>, vector<1x8xf32>
      %110 = vector.broadcast %109 : vector<1x8xf32> to vector<48x8xf32>
      %111 = arith.addf %108, %110 : vector<48x8xf32>
      %c0_80 = arith.constant 0 : index
      %c0_81 = arith.constant 0 : index
      %112 = vector.load %arg8[%c0_80, %c0_81] : memref<48x8xf32, #tpu.memory_space<vmem>>, vector<48x8xf32>
      tpu.vector_store %arg8[%c0_80, %c0_81], %111 {strides = array<i32>} : memref<48x8xf32, #tpu.memory_space<vmem>>, vector<48x8xf32>,
    } else {
    }
    return
  }
  func.func @transform_0(%arg0: i32) -> (i32, i32, i32) {
    %c0_i32 = arith.constant 0 : i32
    %c0_i32_0 = arith.constant 0 : i32
    %c0_i32_1 = arith.constant 0 : i32
    return %arg0, %c0_i32, %c0_i32_0 : i32, i32, i32
  }
  func.func @transform_1(%arg0: i32) -> (i32, i32, i32) {
    %c0_i32 = arith.constant 0 : i32
    %c0_i32_0 = arith.constant 0 : i32
    %c0_i32_1 = arith.constant 0 : i32
    return %arg0, %c0_i32, %c0_i32_0 : i32, i32, i32
  }
  func.func @transform_2(%arg0: i32) -> (i32, i32) {
    %c0_i32 = arith.constant 0 : i32
    %c0_i32_0 = arith.constant 0 : i32
    %c0_i32_1 = arith.constant 0 : i32
    return %c0_i32, %c0_i32_0 : i32, i32
  }
  func.func @transform_3(%arg0: i32) -> (i32, i32, i32) {
    %c0_i32 = arith.constant 0 : i32
    %c0_i32_0 = arith.constant 0 : i32
    %c0_i32_1 = arith.constant 0 : i32
    %c0_i32_2 = arith.constant 0 : i32
    return %c0_i32, %c0_i32_0, %c0_i32_1 : i32, i32, i32
  }
  func.func @transform_4(%arg0: i32) -> (i32, i32) {
    %c0_i32 = arith.constant 0 : i32
    %c0_i32_0 = arith.constant 0 : i32
    %c0_i32_1 = arith.constant 0 : i32
    return %c0_i32, %c0_i32_0 : i32, i32
  }
  func.func @transform_5(%arg0: i32) -> (i32, i32, i32) {
    %c0_i32 = arith.constant 0 : i32
    %c0_i32_0 = arith.constant 0 : i32
    %c0_i32_1 = arith.constant 0 : i32
    %c0_i32_2 = arith.constant 0 : i32
    return %c0_i32, %c0_i32_0, %c0_i32_1 : i32, i32, i32
  }
  func.func @transform_6(%arg0: i32) -> (i32, i32) {
    %c0_i32 = arith.constant 0 : i32
    %c0_i32_0 = arith.constant 0 : i32
    %c0_i32_1 = arith.constant 0 : i32
    return %c0_i32, %c0_i32_0 : i32, i32
  }
  func.func @transform_7(%arg0: i32) -> (i32, i32) {
    %c0_i32 = arith.constant 0 : i32
    %c0_i32_0 = arith.constant 0 : i32
    %c0_i32_1 = arith.constant 0 : i32
    return %c0_i32, %c0_i32_0 : i32, i32
  }
}

</mosaic_0001>

<bundles_post_ra>
// kernel: wavenet_forward.1
= control target key start
LH: loop header
LB: loop body
LE: loop exit
PB: predicated region body
PF: predicated region fallthrough
CT: control target
= control target key end

     0   :  { %s4106_s24 = smov 0   ;;  %s5075_s0 = inlined_call_operand.vmem [shape: bf16[8,64,320], index: 0, kind: input, shape index: {}]   ;;  %s5076_s1 = inlined_call_operand.vmem [shape: bf16[8,320,144], index: 1, kind: input, shape index: {}]   ;;  %s5077_s2 = inlined_call_operand.vmem [shape: f32[1,144], index: 2, kind: input, shape index: {}]   ;;  %s5078_s3 = inlined_call_operand.vmem [shape: bf16[8,144,48], index: 3, kind: input, shape index: {}]   ;;  %s5079_s4 = inlined_call_operand.vmem [shape: f32[1,48], index: 4, kind: input, shape index: {}]   ;;  %s5080_s5 = inlined_call_operand.vmem [shape: bf16[8,48,8], index: 5, kind: input, shape index: {}]   ;;  %s5081_s6 = inlined_call_operand.vmem [shape: f32[1,8], index: 6, kind: input, shape index: {}]   ;;  %s5082_s7 = inlined_call_operand.vmem [shape: f32[48,8], index: 7, kind: output, shape index: {}]  }
   0x1 LB: > { %s4112_s25 = sadd.s32 4294967295, %s4063_s24   ;;  %p3053_p0 = scmp.ge.s32.totalorder %s4063_s24, 1  ;;  %s4063_s24 = sphi %s4106_s24, %s17_s24  }
   0x2   : > { %p242_p1 = scmp.lt.s32.totalorder %s4063_s24, 9 }
   0x4   : > { %p243_p2 = pnand %p3053_p0, %p242_p1 }
   0x5   : > { %p274_p3 = scmp.lt.s32.totalorder (!%p243_p2), %s4112_s25, 7  ;;  %p3056_p4 = scmp.ne.s32.totalorder (!%p243_p2), %s4112_s25, 0 }
   0x6   : > { %246 = sbr.rel (%p243_p2) target bundleno = 918 (0x396), region = 48 }
   0xb   : > { %s275_s26 = scalar_select %p274_p3, %s4112_s25, 7 }
   0xc   : > { %288 = sbr.rel (%p3056_p4) target bundleno = 34 (0x22), region = 52 }
   0xd   : > { %s4044_s27 = smul.u32 96, %s275_s26 }
   0xe   : > { %s4045_s28 = smul.u32 320, %s275_s26 }
   0xf   : > { %s4121_s8 = scalar_lea.vmem %s5075_s0, %s4044_s27 }
  0x10   : > { %s4126_s11 = scalar_lea.vmem %s5076_s1, %s4045_s28 }
  0x11   : > { %v4065_v0 = vmov 0.0   ;;  %vm290_vm0 = vcmask 130048  }
  0x12   : > { %289 = vst [vmem:[#allocation2] sm:$0xff] %v4065_v0 }
  0x13   : > { %292 = vst [vmem:[#allocation2 + $0x10] sm:$0xff] %v4065_v0 }
  0x14   : > { %294 = vst [vmem:[#allocation2 + $0x20] sm:$0xff] %v4065_v0 }
  0x15   : > { %296 = vst [vmem:[#allocation2 + $0x30] sm:$0xff] %v4065_v0 }
  0x16   : > { %298 = vst [vmem:[#allocation2 + $0x40] sm:$0xff] %v4065_v0 }
  0x17   : > { %300 = vst [vmem:[#allocation2 + $0x50] sm:$0xff] %v4065_v0 }
  0x18   : > { %302 = vst [vmem:[#allocation2 + $0x60] sm:$0xff] %v4065_v0 }
  0x19   : > { %304 = vst [vmem:[#allocation2 + $0x70] sm:$0xff] %v4065_v0 }
  0x1a   : > { %291 = vst.msk [vmem:[#allocation2 + $0x8] sm:$0xff] %vm290_vm0, %v4065_v0 }
  0x1b   : > { %293 = vst.msk [vmem:[#allocation2 + $0x18] sm:$0xff] %vm290_vm0, %v4065_v0 }
  0x1c   : > { %295 = vst.msk [vmem:[#allocation2 + $0x28] sm:$0xff] %vm290_vm0, %v4065_v0 }
  0x1d   : > { %297 = vst.msk [vmem:[#allocation2 + $0x38] sm:$0xff] %vm290_vm0, %v4065_v0 }
  0x1e   : > { %299 = vst.msk [vmem:[#allocation2 + $0x48] sm:$0xff] %vm290_vm0, %v4065_v0 }
  0x1f   : > { %301 = vst.msk [vmem:[#allocation2 + $0x58] sm:$0xff] %vm290_vm0, %v4065_v0 }
  0x20   : > { %303 = vst.msk [vmem:[#allocation2 + $0x68] sm:$0xff] %vm290_vm0, %v4065_v0 }
  0x21   : > { %305 = vst.msk [vmem:[#allocation2 + $0x78] sm:$0xff] %vm290_vm0, %v4065_v0 }
  0x22 PF: > { %v3163_v1 = vld [vmem:[%s4126_s11 + $0x70] sm:$0xf]  ;;  %v3911_v2 = vld [vmem:[%s4126_s11 + $0x74] sm:$0xf0]  ;;  %v3155_v6 = vld [vmem:[%s4126_s11 + $0x60] sm:$0xf] }
  0x23   : > { %v3259_v3 = vld [vmem:[%s4126_s11 + $0x130] sm:$0xf]  ;;  %v3164_v4 = vor.u32 %v3911_v2, %v3163_v1  ;;  %v3935_v5 = vld [vmem:[%s4126_s11 + $0x134] sm:$0xf0]  ;;  %v3909_v7 = vld [vmem:[%s4126_s11 + $0x64] sm:$0xf0] }
  0x24   : > { %v3260_v8 = vor.u32 %v3935_v5, %v3259_v3  ;;  %v3251_v9 = vld [vmem:[%s4126_s11 + $0x120] sm:$0xf]  ;;  %v3933_v10 = vld [vmem:[%s4126_s11 + $0x124] sm:$0xf0]  ;;  %v3156_v11 = vor.u32 %v3909_v7, %v3155_v6  ;;  %v3147_v13 = vld [vmem:[%s4126_s11 + $0x50] sm:$0xf] }
  0x25   : > { %651 = vmatpush.bf16.msra.mxu0 %v3164_v4  ;;  %4032 = vmatpush.bf16.msra.mxu1 %v3164_v4  ;;  %v3252_v12 = vor.u32 %v3933_v10, %v3251_v9  ;;  %v3907_v14 = vld [vmem:[%s4126_s11 + $0x54] sm:$0xf0]  ;;  %v3243_v15 = vld [vmem:[%s4126_s11 + $0x110] sm:$0xf]  ;;  %v3139_v19 = vld [vmem:[%s4126_s11 + $0x40] sm:$0xf] }
  0x26   : > { %713 = vmatpush.bf16.msra.mxu2 %v3260_v8  ;;  %4040 = vmatpush.bf16.msra.mxu3 %v3260_v8  ;;  %v3931_v16 = vld [vmem:[%s4126_s11 + $0x114] sm:$0xf0]  ;;  %v3148_v17 = vor.u32 %v3907_v14, %v3147_v13  ;;  %v3905_v20 = vld [vmem:[%s4126_s11 + $0x44] sm:$0xf0]  ;;  %v3235_v21 = vld [vmem:[%s4126_s11 + $0x100] sm:$0xf] }
  0x27   : > { %v3244_v18 = vor.u32 %v3931_v16, %v3243_v15  ;;  %v3929_v22 = vld [vmem:[%s4126_s11 + $0x104] sm:$0xf0]  ;;  %v3910_v23 = vld [vmem:[%s4126_s11 + $0x74] sm:$0xf]  ;;  %v3165_v24 = vld [vmem:[%s4126_s11 + $0x78] sm:$0xf0]  ;;  %v3140_v27 = vor.u32 %v3905_v20, %v3139_v19 }
  0x28   : > { %v3926_v25 = vld [vmem:[%s4126_s11 + $0xf4] sm:$0xf]  ;;  %v3229_v26 = vld [vmem:[%s4126_s11 + $0xf8] sm:$0xf0]  ;;  %v3131_v28 = vld [vmem:[%s4126_s11 + $0x30] sm:$0xf]  ;;  %v3236_v29 = vor.u32 %v3929_v22, %v3235_v21  ;;  %v3168_v35 = vor.u32 %v3910_v23, %v3165_v24 }
  0x29   : > { %652 = vmatpush.bf16.msra.mxu0 %v3156_v11  ;;  %4033 = vmatpush.bf16.msra.mxu1 %v3156_v11  ;;  %v3903_v30 = vld [vmem:[%s4126_s11 + $0x34] sm:$0xf0]  ;;  %v3067_v31 = vld [vmem:[%s4121_s8 + $0x8] sm:$0xf]  ;;  %v3886_v32 = vld [vmem:[%s4121_s8 + $0x10] sm:$0xf0]  ;;  %v3232_v36 = vor.u32 %v3926_v25, %v3229_v26 }
  0x2a   : > { %714 = vmatpush.bf16.msra.mxu2 %v3252_v12  ;;  %4041 = vmatpush.bf16.msra.mxu3 %v3252_v12  ;;  %v3091_v33 = vld [vmem:[%s4121_s8 + $0x38] sm:$0xf]  ;;  %v3892_v34 = vld [vmem:[%s4121_s8 + $0x40] sm:$0xf0]  ;;  %v3157_v38 = vld [vmem:[%s4126_s11 + $0x68] sm:$0xf0]  ;;  %v3132_v41 = vor.u32 %v3903_v30, %v3131_v28  ;;  %v4159_v42 = vor.u32 %v3886_v32, %v3067_v31 }
  0x2b   : > { %v3908_v37 = vld [vmem:[%s4126_s11 + $0x64] sm:$0xf]  ;;  %v3221_v40 = vld [vmem:[%s4126_s11 + $0xe8] sm:$0xf0]  ;;  %v4161_v43 = vor.u32 %v3892_v34, %v3091_v33  ;;  %v3123_v44 = vld [vmem:[%s4126_s11 + $0x20] sm:$0xf] }
  0x2c   : > { %v3924_v39 = vld [vmem:[%s4126_s11 + $0xe4] sm:$0xf]  ;;  %v3901_v45 = vld [vmem:[%s4126_s11 + $0x24] sm:$0xf0]  ;;  %vm638_vm1 = vcmask 523264   ;;  %v3160_v46 = vor.u32 %v3908_v37, %v3157_v38  ;;  %vm842_vm2 = vcmask 130048  }
  0x2d   : > { %653 = vmatpush.bf16.msra.mxu0 %v3148_v17  ;;  %4034 = vmatpush.bf16.msra.mxu1 %v3148_v17  ;;  %v3224_v47 = vor.u32 %v3924_v39, %v3221_v40  ;;  %v3906_v48 = vld [vmem:[%s4126_s11 + $0x54] sm:$0xf]  ;;  %v3149_v49 = vld [vmem:[%s4126_s11 + $0x58] sm:$0xf0]  ;;  %v3124_v52 = vor.u32 %v3901_v45, %v3123_v44  ;;  %v3115_v53 = vld [vmem:[%s4126_s11 + $0x10] sm:$0xf] }
  0x2e   : > { %715 = vmatpush.bf16.msra.mxu2 %v3244_v18  ;;  %4042 = vmatpush.bf16.msra.mxu3 %v3244_v18  ;;  %v3922_v50 = vld [vmem:[%s4126_s11 + $0xd4] sm:$0xf]  ;;  %v3213_v51 = vld [vmem:[%s4126_s11 + $0xd8] sm:$0xf0]  ;;  %v3899_v54 = vld [vmem:[%s4126_s11 + $0x14] sm:$0xf0]  ;;  %v3152_v55 = vor.u32 %v3906_v48, %v3149_v49 }
  0x2f   : > { %v3216_v56 = vor.u32 %v3922_v50, %v3213_v51  ;;  %v3904_v57 = vld [vmem:[%s4126_s11 + $0x44] sm:$0xf]  ;;  %v3141_v58 = vld [vmem:[%s4126_s11 + $0x48] sm:$0xf0]  ;;  %v3116_v61 = vor.u32 %v3899_v54, %v3115_v53  ;;  %v3107_v62 = vld [vmem:[%s4126_s11] sm:$0xf] }
  0x30   : > { %v3920_v59 = vld [vmem:[%s4126_s11 + $0xc4] sm:$0xf]  ;;  %v3205_v60 = vld [vmem:[%s4126_s11 + $0xc8] sm:$0xf0]  ;;  %v3897_v63 = vld [vmem:[%s4126_s11 + $0x4] sm:$0xf0]  ;;  %v3144_v2 = vor.u32 %v3904_v57, %v3141_v58 }
  0x31   : > { %654 = vmatpush.bf16.msra.mxu0 %v3140_v27  ;;  %4035 = vmatpush.bf16.msra.mxu1 %v3140_v27  ;;  %v3227_v0 = vld [vmem:[%s4126_s11 + $0xf0] sm:$0xf]  ;;  %v3927_v1 = vld [vmem:[%s4126_s11 + $0xf4] sm:$0xf0]  ;;  %v3208_v3 = vor.u32 %v3920_v59, %v3205_v60  ;;  %v3059_v4 = vld [vmem:[%s4121_s8] sm:$0xf]  ;;  %v3108_v11 = vor.u32 %v3897_v63, %v3107_v62 }
  0x32   : > { %716 = vmatpush.bf16.msra.mxu2 %v3236_v29  ;;  %4043 = vmatpush.bf16.msra.mxu3 %v3236_v29  ;;  %v3934_v5 = vld [vmem:[%s4126_s11 + $0x134] sm:$0xf]  ;;  %v3261_v6 = vld [vmem:[%s4126_s11 + $0x138] sm:$0xf0]  ;;  %v3885_v12 = vld [vmem:[%s4121_s8 + $0x8] sm:$0xf0]  ;;  %v3228_v15 = vor.u32 %v3927_v1, %v3227_v0 }
  0x33   : > { %v3902_v7 = vld [vmem:[%s4126_s11 + $0x34] sm:$0xf]  ;;  %v3133_v8 = vld [vmem:[%s4126_s11 + $0x38] sm:$0xf0]  ;;  %v3083_v13 = vld [vmem:[%s4121_s8 + $0x30] sm:$0xf]  ;;  %v3264_v19 = vor.u32 %v3934_v5, %v3261_v6  ;;  %v4199_v25 = vor.u32 %v3885_v12, %v3059_v4 }
  0x34   : > { %v3918_v9 = vld [vmem:[%s4126_s11 + $0xb4] sm:$0xf]  ;;  %v3197_v10 = vld [vmem:[%s4126_s11 + $0xb8] sm:$0xf0]  ;;  %v3079_v16 = vld [vmem:[%s4121_s8 + $0x20] sm:$0xf]  ;;  %v3136_v21 = vor.u32 %v3902_v7, %v3133_v8 }
  0x35   : > { %655 = vmatpush.bf16.msra.mxu0 %v3132_v41  ;;  %4036 = vmatpush.bf16.msra.mxu1 %v3132_v41  ;;  %v3891_v14 = vld [vmem:[%s4121_s8 + $0x38] sm:$0xf0]  ;;  %v3889_v17 = vld [vmem:[%s4121_s8 + $0x28] sm:$0xf0]  ;;  %v3103_v18 = vld [vmem:[%s4121_s8 + $0x50] sm:$0xf]  ;;  %v3200_v22 = vor.u32 %v3918_v9, %v3197_v10 }
  0x36   : > { %738 = vmatpush.bf16.msrb.mxu3 %v3168_v35  ;;  %767 = vmatpush.bf16.msrb.mxu2 %v3232_v36  ;;  %v3895_v20 = vld [vmem:[%s4121_s8 + $0x58] sm:$0xf0]  ;;  %v3219_v23 = vld [vmem:[%s4126_s11 + $0xe0] sm:$0xf]  ;;  %v3925_v24 = vld [vmem:[%s4126_s11 + $0xe4] sm:$0xf0]  ;;  %v4201_v26 = vor.u32 %v3891_v14, %v3083_v13  ;;  %v4209_v33 = vor.u32 %v3889_v17, %v3079_v16 }
  0x37   : > { %3265 = vmatmul.msk.bf16.vlgmr.msra.gmra.mxu2 %vm638_vm1, %v4159_v42  ;;  %3267 = vmatmul.msk.bf16.vlgmr.msra.gmra.mxu3 %vm638_vm1, %v4161_v43  ;;  %v3900_v27 = vld [vmem:[%s4126_s11 + $0x24] sm:$0xf]  ;;  %v3125_v28 = vld [vmem:[%s4126_s11 + $0x28] sm:$0xf0]  ;;  %v4211_v34 = vor.u32 %v3895_v20, %v3103_v18  ;;  %v3220_v35 = vor.u32 %v3925_v24, %v3219_v23  ;;  %v3211_v37 = vld [vmem:[%s4126_s11 + $0xd0] sm:$0xf] }
  0x38   : > { %v3916_v29 = vld [vmem:[%s4126_s11 + $0xa4] sm:$0xf]  ;;  %v3189_v30 = vld [vmem:[%s4126_s11 + $0xa8] sm:$0xf0]  ;;  %v3128_v36 = vor.u32 %v3900_v27, %v3125_v28  ;;  %v3923_v38 = vld [vmem:[%s4126_s11 + $0xd4] sm:$0xf0] }
  0x39   : > { %656 = vmatpush.bf16.msra.mxu0 %v3124_v52  ;;  %4037 = vmatpush.bf16.msra.mxu1 %v3124_v52  ;;  %v3932_v31 = vld [vmem:[%s4126_s11 + $0x124] sm:$0xf]  ;;  %v3253_v32 = vld [vmem:[%s4126_s11 + $0x128] sm:$0xf0]  ;;  %v3192_v39 = vor.u32 %v3916_v29, %v3189_v30  ;;  %v3898_v41 = vld [vmem:[%s4126_s11 + $0x14] sm:$0xf]  ;;  %v3212_v49 = vor.u32 %v3923_v38, %v3211_v37 }
  0x3a   : > { %739 = vmatpush.bf16.msrb.mxu3 %v3160_v46  ;;  %768 = vmatpush.bf16.msrb.mxu2 %v3224_v47  ;;  %v3256_v40 = vor.u32 %v3932_v31, %v3253_v32  ;;  %v3117_v44 = vld [vmem:[%s4126_s11 + $0x18] sm:$0xf0]  ;;  %v3914_v45 = vld [vmem:[%s4126_s11 + $0x94] sm:$0xf]  ;;  %v3203_v51 = vld [vmem:[%s4126_s11 + $0xc0] sm:$0xf] }
  0x3b   : > { %v3181_v46 = vld [vmem:[%s4126_s11 + $0x98] sm:$0xf0]  ;;  %v3930_v47 = vld [vmem:[%s4126_s11 + $0x114] sm:$0xf]  ;;  %v3120_v50 = vor.u32 %v3898_v41, %v3117_v44  ;;  %v3921_v52 = vld [vmem:[%s4126_s11 + $0xc4] sm:$0xf0] }
  0x3c   : > { %v3245_v48 = vld [vmem:[%s4126_s11 + $0x118] sm:$0xf0]  ;;  %v3184_v53 = vor.u32 %v3914_v45, %v3181_v46  ;;  %v3896_v54 = vld [vmem:[%s4126_s11 + $0x4] sm:$0xf]  ;;  %v3173_v58 = vld [vmem:[%s4126_s11 + $0x88] sm:$0xf0] }
  0x3d   : > { %657 = vmatpush.bf16.msra.mxu0 %v3116_v61  ;;  %4038 = vmatpush.bf16.msra.mxu1 %v3116_v61  ;;  %v3248_v57 = vor.u32 %v3930_v47, %v3245_v48  ;;  %v3928_v59 = vld [vmem:[%s4126_s11 + $0x104] sm:$0xf]  ;;  %v3237_v60 = vld [vmem:[%s4126_s11 + $0x108] sm:$0xf0]  ;;  %v3204_v61 = vor.u32 %v3921_v52, %v3203_v51  ;;  %v3071_v0 = vld [vmem:[%s4121_s8 + $0x18] sm:$0xf] }
  0x3e   : > { %740 = vmatpush.bf16.msrb.mxu3 %v3152_v55  ;;  %769 = vmatpush.bf16.msrb.mxu2 %v3216_v56  ;;  %v3109_v55 = vld [vmem:[%s4126_s11 + $0x8] sm:$0xf0]  ;;  %v3912_v56 = vld [vmem:[%s4126_s11 + $0x84] sm:$0xf]  ;;  %v3195_v1 = vld [vmem:[%s4126_s11 + $0xb0] sm:$0xf] }
  0x3f   : > { %v3112_v62 = vor.u32 %v3896_v54, %v3109_v55  ;;  %v3176_v63 = vor.u32 %v3912_v56, %v3173_v58  ;;  %v3888_v4 = vld [vmem:[%s4121_s8 + $0x20] sm:$0xf0]  ;;  %v3095_v5 = vld [vmem:[%s4121_s8 + $0x48] sm:$0xf]  ;;  %v3894_v6 = vld [vmem:[%s4121_s8 + $0x50] sm:$0xf0] }
  0x40   : > { %v3884_v8 = vld [vmem:[%s4121_s8 + $0x4] sm:$0xf]  ;;  %v3061_v9 = vld [vmem:[%s4121_s8 + $0xc] sm:$0xf0]  ;;  %v3072_v10 = vor.u32 %v3888_v4, %v3071_v0  ;;  %v3187_v12 = vld [vmem:[%s4126_s11 + $0xa0] sm:$0xf] }
  0x41   : > { %658 = vmatpush.bf16.msra.mxu0 %v3108_v11  ;;  %4039 = vmatpush.bf16.msra.mxu1 %v3108_v11  ;;  %v3096_v11 = vor.u32 %v3894_v6, %v3095_v5  ;;  %v3917_v13 = vld [vmem:[%s4126_s11 + $0xa4] sm:$0xf0]  ;;  %v3064_v14 = vor.u32 %v3884_v8, %v3061_v9  ;;  %v3179_v16 = vld [vmem:[%s4126_s11 + $0x90] sm:$0xf]  ;;  %v3915_v17 = vld [vmem:[%s4126_s11 + $0x94] sm:$0xf0] }
  0x42   : > { %741 = vmatpush.bf16.msrb.mxu3 %v3144_v2  ;;  %770 = vmatpush.bf16.msrb.mxu2 %v3208_v3  ;;  %v3919_v2 = vld [vmem:[%s4126_s11 + $0xb4] sm:$0xf0]  ;;  %v3240_v3 = vor.u32 %v3928_v59, %v3237_v60  ;;  %v3180_v18 = vor.u32 %v3915_v17, %v3179_v16  ;;  %v3913_v20 = vld [vmem:[%s4126_s11 + $0x84] sm:$0xf0]  ;;  %v3085_v27 = vld [vmem:[%s4121_s8 + $0x3c] sm:$0xf0] }
  0x43   : > { %v3196_v7 = vor.u32 %v3919_v2, %v3195_v1  ;;  %v3073_v23 = vld [vmem:[%s4121_s8 + $0x24] sm:$0xf0]  ;;  %v3893_v29 = vld [vmem:[%s4121_s8 + $0x4c] sm:$0xf]  ;;  %v3097_v30 = vld [vmem:[%s4121_s8 + $0x54] sm:$0xf0] }
  0x44   : > { %659 = vmatmul.bf16.vlgmr.msra.gmra.mxu0 %v4199_v25  ;;  %669 = vmatmul.bf16.vlgmr.msra.gmra.mxu1 %v4201_v26  ;;  %v3100_v31 = vor.u32 %v3893_v29, %v3097_v30  ;;  %v307_v51 = vld [vmem:[#allocation2 + $0x8] sm:$0xff]  ;;  %v308_v5 = vld [vmem:[#allocation2 + $0x10] sm:$0xff]  ;;  %v310_v17 = vld [vmem:[#allocation2 + $0x20] sm:$0xff]  ;;  %p3273_p5 = scmp.ne.s32.totalorder %s4112_s25, 7 }
  0x45   : > { %680 = vmatpush.bf16.msrb.mxu1 %v3228_v15  ;;  %800 = vmatpush.bf16.msrb.mxu0 %v3264_v19  ;;  %v3188_v15 = vor.u32 %v3917_v13, %v3187_v12  ;;  %v3171_v19 = vld [vmem:[%s4126_s11 + $0x80] sm:$0xf] }
  0x46   : > { %742 = vmatpush.bf16.msrb.mxu3 %v3136_v21  ;;  %771 = vmatpush.bf16.msrb.mxu2 %v3200_v22  ;;  %v3172_v21 = vor.u32 %v3913_v20, %v3171_v19  ;;  %v3887_v22 = vld [vmem:[%s4121_s8 + $0x1c] sm:$0xf]  ;;  %v312_v30 = vld [vmem:[#allocation2 + $0x30] sm:$0xff] }
  0x47   : > { %3266 = vmatmul.msk.bf16.gmra.mxu2 %vm638_vm1, %v4209_v33  ;;  %3268 = vmatmul.msk.bf16.gmra.mxu3 %vm638_vm1, %v4211_v34  ;;  %v3076_v24 = vor.u32 %v3887_v22, %v3073_v23  ;;  %v313_v23 = vld [vmem:[#allocation2 + $0x38] sm:$0xff] }
  0x49   : > { %681 = vmatpush.bf16.msrb.mxu1 %v3220_v35  ;;  %801 = vmatpush.bf16.msrb.mxu0 %v3256_v40 }
  0x4a   : > { %743 = vmatpush.bf16.msrb.mxu3 %v3128_v36  ;;  %772 = vmatpush.bf16.msrb.mxu2 %v3192_v39 }
  0x4d   : > { %682 = vmatpush.bf16.msrb.mxu1 %v3212_v49  ;;  %802 = vmatpush.bf16.msrb.mxu0 %v3248_v57  ;;  %v306_v57 = vld [vmem:[#allocation2] sm:$0xff] }
  0x4e   : > { %744 = vmatpush.bf16.msrb.mxu3 %v3120_v50  ;;  %773 = vmatpush.bf16.msrb.mxu2 %v3184_v53 }
  0x51   : > { %683 = vmatpush.bf16.msrb.mxu1 %v3204_v61  ;;  %803 = vmatpush.bf16.msrb.mxu0 %v3240_v3 }
  0x52   : > { %745 = vmatpush.bf16.msrb.mxu3 %v3112_v62  ;;  %774 = vmatpush.bf16.msrb.mxu2 %v3176_v63  ;;  %v309_v63 = vld [vmem:[#allocation2 + $0x18] sm:$0xff] }
  0x54   : > { %664 = vmatmul.bf16.gmra.mxu0 %v3072_v10  ;;  %674 = vmatmul.bf16.gmra.mxu1 %v3096_v11 }
  0x55   : > { %684 = vmatpush.bf16.msrb.mxu1 %v3196_v7 }
  0x57   : > { %746 = vmatmul.bf16.vlgmr.msrb.gmra.mxu3 %v4199_v25  ;;  %775 = vmatmul.bf16.vlgmr.msrb.gmra.mxu2 %v3064_v14  ;;  %v3890_v25 = vld [vmem:[%s4121_s8 + $0x34] sm:$0xf] }
  0x58   : > { %v3088_v28 = vor.u32 %v3890_v25, %v3085_v27 }
  0x59   : > { %685 = vmatpush.bf16.msrb.mxu1 %v3188_v15 }
  0x5d   : > { %686 = vmatpush.bf16.msrb.mxu1 %v3180_v18 }
  0x61   : > { %687 = vmatpush.bf16.msrb.mxu1 %v3172_v21 }
  0x64   : > { %688 = vmatmul.bf16.vlgmr.msrb.gmra.mxu1 %v3064_v14  ;;  %3269 = vmatmul.msk.bf16.vlgmr.msrb.gmra.mxu0 %vm638_vm1, %v4159_v42 }
  0x67   : > { %751 = vmatmul.bf16.gmra.mxu3 %v3072_v10  ;;  %780 = vmatmul.bf16.gmra.mxu2 %v3076_v24 }
  0x74   : > { %693 = vmatmul.bf16.gmra.mxu1 %v3076_v24  ;;  %3270 = vmatmul.msk.bf16.gmra.mxu0 %vm638_vm1, %v4209_v33 }
  0x77   : > { %756 = vmatmul.bf16.gmra.mxu3 %v4201_v26  ;;  %785 = vmatmul.bf16.gmra.mxu2 %v3088_v28 }
  0x84   : > { %698 = vmatmul.bf16.gmra.mxu1 %v3088_v28  ;;  %3271 = vmatmul.msk.bf16.gmra.mxu0 %vm638_vm1, %v4161_v43 }
  0x87   : > { %761 = vmatmul.bf16.gmra.mxu3 %v3096_v11  ;;  %790 = vmatmul.bf16.gmra.mxu2 %v3100_v31  ;;  %v311_v11 = vld [vmem:[#allocation2 + $0x28] sm:$0xff] }
  0x94   : > { %703 = vmatmul.bf16.gmra.mxu1 %v3100_v31  ;;  %3272 = vmatmul.msk.bf16.gmra.mxu0 %vm638_vm1, %v4211_v34 }
  0xba   : > { %v718_v42 = vpop.f32.mrf.mxu2  ;;  %v4265_v32 = vpop.f32.mrf.mxu3 }
  0xc1   : > { %v660_v33 = vpop.f32.mrf.mxu0  ;;  %v4267_v35 = vpop.f32.mrf.mxu1 }
  0xc2   : > { %v720_v26 = vpop.f32.mrf.mxu2  ;;  %v4269_v36 = vpop.f32.mrf.mxu3 }
  0xc9   : > { %v662_v37 = vpop.f32.mrf.mxu0  ;;  %v4271_v38 = vpop.f32.mrf.mxu1 }
  0xca   : > { %v723_v39 = vpop.f32.mrf.mxu2  ;;  %v4273_v43 = vpop.f32.mrf.mxu3 }
  0xd1   : > { %v665_v40 = vpop.f32.mrf.mxu0  ;;  %v4275_v41 = vpop.f32.mrf.mxu1 }
  0xd2   : > { %v725_v44 = vpop.f32.mrf.mxu2  ;;  %v4277_v34 = vpop.f32.mrf.mxu3 }
  0xd9   : > { %v667_v45 = vpop.f32.mrf.mxu0  ;;  %v4279_v46 = vpop.f32.mrf.mxu1 }
  0xda   : > { %v747_v47 = vpop.f32.mrf.mxu3  ;;  %v776_v48 = vpop.f32.mrf.mxu2 }
  0xdb   : > { %v777_v49 = vadd.f32 %v776_v48, %v747_v47 }
  0xe1   : > { %v689_v50 = vpop.f32.mrf.mxu1  ;;  %v805_v52 = vpop.f32.mrf.mxu0 }
  0xe2   : > { %v690_v53 = vadd.f32 %v689_v50, %v660_v33  ;;  %v749_v54 = vpop.f32.mrf.mxu3  ;;  %v778_v55 = vpop.f32.mrf.mxu2  ;;  %v806_v56 = vadd.f32 %v805_v52, %v777_v49 }
  0xe3   : > { %v779_v61 = vadd.f32 %v778_v55, %v749_v54  ;;  %v317_v55 = vld [vmem:[#allocation2 + $0x58] sm:$0xff] }
  0xe4   : > { %v719_v58 = vadd.f32 %v718_v42, %v690_v53  ;;  %v826_v59 = vadd.f32 %v806_v56, %v307_v51 }
  0xe6   : > { %v825_v60 = vadd.f32 %v719_v58, %v306_v57  ;;  %843 = vst.msk [vmem:[#allocation2 + $0x8] sm:$0xff] %vm842_vm2, %v826_v59  ;;  %v316_v59 = vld [vmem:[#allocation2 + $0x50] sm:$0xff] }
  0xe8   : > { %841 = vst [vmem:[#allocation2] sm:$0xff] %v825_v60 }
  0xe9   : > { %v691_v62 = vpop.f32.mrf.mxu1  ;;  %v807_v0 = vpop.f32.mrf.mxu0 }
  0xea   : > { %v692_v1 = vadd.f32 %v691_v62, %v662_v37  ;;  %v752_v2 = vpop.f32.mrf.mxu3  ;;  %v781_v3 = vpop.f32.mrf.mxu2  ;;  %v808_v4 = vadd.f32 %v807_v0, %v779_v61 }
  0xeb   : > { %v782_v9 = vadd.f32 %v781_v3, %v752_v2 }
  0xec   : > { %v721_v6 = vadd.f32 %v720_v26, %v692_v1  ;;  %v828_v7 = vadd.f32 %v808_v4, %v309_v63  ;;  %v319_v1 = vld [vmem:[#allocation2 + $0x68] sm:$0xff] }
  0xee   : > { %v827_v8 = vadd.f32 %v721_v6, %v308_v5  ;;  %845 = vst.msk [vmem:[#allocation2 + $0x18] sm:$0xff] %vm842_vm2, %v828_v7  ;;  %v318_v5 = vld [vmem:[#allocation2 + $0x60] sm:$0xff] }
  0xf0   : > { %844 = vst [vmem:[#allocation2 + $0x10] sm:$0xff] %v827_v8 }
  0xf1   : > { %v694_v10 = vpop.f32.mrf.mxu1  ;;  %v810_v12 = vpop.f32.mrf.mxu0 }
  0xf2   : > { %v695_v13 = vadd.f32 %v694_v10, %v665_v40  ;;  %v754_v14 = vpop.f32.mrf.mxu3  ;;  %v783_v15 = vpop.f32.mrf.mxu2  ;;  %v811_v16 = vadd.f32 %v810_v12, %v782_v9 }
  0xf3   : > { %v784_v21 = vadd.f32 %v783_v15, %v754_v14  ;;  %v320_v15 = vld [vmem:[#allocation2 + $0x70] sm:$0xff] }
  0xf4   : > { %v724_v18 = vadd.f32 %v723_v39, %v695_v13  ;;  %v830_v19 = vadd.f32 %v811_v16, %v311_v11  ;;  %v315_v39 = vld [vmem:[#allocation2 + $0x48] sm:$0xff]  ;;  %v321_v11 = vld [vmem:[#allocation2 + $0x78] sm:$0xff] }
  0xf6   : > { %v829_v20 = vadd.f32 %v724_v18, %v310_v17  ;;  %847 = vst.msk [vmem:[#allocation2 + $0x28] sm:$0xff] %vm842_vm2, %v830_v19 }
  0xf8   : > { %846 = vst [vmem:[#allocation2 + $0x20] sm:$0xff] %v829_v20 }
  0xf9   : > { %v696_v22 = vpop.f32.mrf.mxu1  ;;  %v812_v24 = vpop.f32.mrf.mxu0 }
  0xfa   : > { %v697_v25 = vadd.f32 %v696_v22, %v667_v45  ;;  %v757_v27 = vpop.f32.mrf.mxu3  ;;  %v786_v28 = vpop.f32.mrf.mxu2  ;;  %v813_v29 = vadd.f32 %v812_v24, %v784_v21  ;;  %v314_v45 = vld [vmem:[#allocation2 + $0x40] sm:$0xff] }
  0xfb   : > { %v787_v26 = vadd.f32 %v786_v28, %v757_v27 }
  0xfc   : > { %v726_v31 = vadd.f32 %v725_v44, %v697_v25  ;;  %v832_v42 = vadd.f32 %v813_v29, %v313_v23 }
  0xfe   : > { %v831_v33 = vadd.f32 %v726_v31, %v312_v30  ;;  %849 = vst.msk [vmem:[#allocation2 + $0x38] sm:$0xff] %vm842_vm2, %v832_v42 }
 0x100   : > { %848 = vst [vmem:[#allocation2 + $0x30] sm:$0xff] %v831_v33 }
 0x101   : > { %v699_v37 = vpop.f32.mrf.mxu1  ;;  %v815_v40 = vpop.f32.mrf.mxu0 }
 0x102   : > { %v700_v47 = vadd.f32 %v699_v37, %v4267_v35  ;;  %v759_v48 = vpop.f32.mrf.mxu3  ;;  %v788_v49 = vpop.f32.mrf.mxu2  ;;  %v816_v50 = vadd.f32 %v815_v40, %v787_v26 }
 0x103   : > { %v789_v44 = vadd.f32 %v788_v49, %v759_v48 }
 0x104   : > { %v729_v51 = vadd.f32 %v4265_v32, %v700_v47  ;;  %v834_v52 = vadd.f32 %v816_v50, %v315_v39 }
 0x106   : > { %v833_v53 = vadd.f32 %v729_v51, %v314_v45  ;;  %851 = vst.msk [vmem:[#allocation2 + $0x48] sm:$0xff] %vm842_vm2, %v834_v52 }
 0x108   : > { %850 = vst [vmem:[#allocation2 + $0x40] sm:$0xff] %v833_v53 }
 0x109   : > { %v701_v54 = vpop.f32.mrf.mxu1  ;;  %v817_v56 = vpop.f32.mrf.mxu0 }
 0x10a   : > { %v702_v57 = vadd.f32 %v701_v54, %v4271_v38  ;;  %v818_v58 = vadd.f32 %v817_v56, %v789_v44  ;;  %v762_v35 = vpop.f32.mrf.mxu3  ;;  %v791_v60 = vpop.f32.mrf.mxu2 }
 0x10b   : > { %v792_v32 = vadd.f32 %v791_v60, %v762_v35 }
 0x10c   : > { %v731_v61 = vadd.f32 %v4269_v36, %v702_v57  ;;  %v836_v62 = vadd.f32 %v818_v58, %v317_v55 }
 0x10e   : > { %v835_v63 = vadd.f32 %v731_v61, %v316_v59  ;;  %853 = vst.msk [vmem:[#allocation2 + $0x58] sm:$0xff] %vm842_vm2, %v836_v62 }
 0x110   : > { %852 = vst [vmem:[#allocation2 + $0x50] sm:$0xff] %v835_v63 }
 0x111   : > { %v704_v0 = vpop.f32.mrf.mxu1  ;;  %v820_v2 = vpop.f32.mrf.mxu0 }
 0x112   : > { %v705_v3 = vadd.f32 %v704_v0, %v4275_v41  ;;  %v821_v4 = vadd.f32 %v820_v2, %v792_v32  ;;  %v764_v7 = vpop.f32.mrf.mxu3  ;;  %v793_v8 = vpop.f32.mrf.mxu2 }
 0x113   : > { %v794_v36 = vadd.f32 %v793_v8, %v764_v7 }
 0x114   : > { %v734_v38 = vadd.f32 %v4273_v43, %v705_v3  ;;  %v838_v6 = vadd.f32 %v821_v4, %v319_v1 }
 0x116   : > { %v837_v9 = vadd.f32 %v734_v38, %v318_v5  ;;  %855 = vst.msk [vmem:[#allocation2 + $0x68] sm:$0xff] %vm842_vm2, %v838_v6 }
 0x118   : > { %854 = vst [vmem:[#allocation2 + $0x60] sm:$0xff] %v837_v9 }
 0x119   : > { %v706_v10 = vpop.f32.mrf.mxu1  ;;  %v822_v12 = vpop.f32.mrf.mxu0 }
 0x11a   : > { %v707_v13 = vadd.f32 %v706_v10, %v4279_v46  ;;  %v823_v14 = vadd.f32 %v822_v12, %v794_v36 }
 0x11c   : > { %v736_v41 = vadd.f32 %v4277_v34, %v707_v13  ;;  %v840_v16 = vadd.f32 %v823_v14, %v321_v11  ;;  %861 = sbr.rel (%p3273_p5) target bundleno = 918 (0x396), region = 56 }
 0x11e   : > { %v839_v17 = vadd.f32 %v736_v41, %v320_v15  ;;  %857 = vst.msk [vmem:[#allocation2 + $0x78] sm:$0xff] %vm842_vm2, %v840_v16 }
 0x120   : > { %856 = vst [vmem:[#allocation2 + $0x70] sm:$0xff] %v839_v17 }
 0x121   : > { %v3952_v43 = vld [vmem:[%s5078_s3 + $0x80] sm:$0xff]  ;;  %v3943_v46 = vld [vmem:[%s5078_s3 + $0x38] sm:$0xff]  ;;  %v3942_v18 = vld [vmem:[%s5078_s3 + $0x30] sm:$0xff]  ;;  %vm993_vm3 = vsmask.f32 7424  ;;  %vm1326_vm4 = vcmask 1046528  }
 0x122   : > { %v3951_v34 = vld [vmem:[%s5078_s3 + $0x78] sm:$0xff]  ;;  %1126 = vmatpush.bf16.msra.mxu0 %v3952_v43  ;;  %1251 = vmatpush.bf16.msra.mxu2 %v3943_v46  ;;  %v3944_v19 = vld [vmem:[%s5078_s3 + $0x40] sm:$0xff]  ;;  %v862_v20 = vld [vmem:[#allocation2] sm:$0xff]  ;;  %vm1493_vm5 = vsmask.f32 6400  ;;  %vm1676_vm6 = vcmask 1045504  }
 0x123   : > { %v863_v21 = vld [vmem:[#allocation2 + $0x8] sm:$0xff]  ;;  %v864_v22 = vld [vmem:[#allocation2 + $0x10] sm:$0xff]  ;;  %1286 = vmatpush.bf16.msra.mxu3 %v3944_v19  ;;  %v865_v24 = vld [vmem:[#allocation2 + $0x18] sm:$0xff]  ;;  %vm1843_vm7 = vsmask.f32 5376  ;;  %vm2026_vm8 = vcmask 1044480  }
 0x124   : > { %v878_v23 = vld [vmem:[%s5077_s2] sm:$0x3]  ;;  %v3953_v28 = vld [vmem:[%s5078_s3 + $0x88] sm:$0xff]  ;;  %v3950_v29 = vld [vmem:[%s5078_s3 + $0x70] sm:$0xff]  ;;  %vm2193_vm9 = vsmask.f32 4352 }
 0x125   : > { %v4316_v25 = vperm.slane %v878_v23, 0  ;;  %v4318_v27 = vperm.slane %v878_v23, 1  ;;  %v3941_v30 = vld [vmem:[%s5078_s3 + $0x28] sm:$0xff]  ;;  %v866_v31 = vld [vmem:[#allocation2 + $0x20] sm:$0xff]  ;;  %v867_v37 = vld [vmem:[#allocation2 + $0x28] sm:$0xff]  ;;  %1161 = vmatpush.bf16.msra.mxu1 %v3953_v28  ;;  %vm2459_vm10 = vcmask 392192  }
 0x126   : > { %1127 = vmatpush.bf16.msra.mxu0 %v3951_v34  ;;  %1252 = vmatpush.bf16.msra.mxu2 %v3942_v18  ;;  %v868_v39 = vld [vmem:[#allocation2 + $0x30] sm:$0xff]  ;;  %v869_v40 = vld [vmem:[#allocation2 + $0x38] sm:$0xff]  ;;  %v3962_v59 = vld [vmem:[%s5078_s3 + $0xd0] sm:$0xff]  ;;  %vm3003_vm11 = vcmask 64512  }
 0x127   : > { %v884_v42 = vadd.f32 %v4316_v25, %v862_v20  ;;  %v885_v33 = vadd.f32 %v4318_v27, %v863_v21  ;;  %v886_v26 = vadd.f32 %v4316_v25, %v864_v22  ;;  %v887_v47 = vadd.f32 %v4318_v27, %v865_v24  ;;  %v3949_v53 = vld [vmem:[%s5078_s3 + $0x68] sm:$0xff]  ;;  %v3940_v55 = vld [vmem:[%s5078_s3 + $0x20] sm:$0xff]  ;;  %v870_v61 = vld [vmem:[#allocation2 + $0x40] sm:$0xff]  ;;  %1446 = vmatpush.bf16.msrb.mxu3 %v3962_v59 }
 0x128   : > { %v888_v48 = vadd.f32 %v4316_v25, %v866_v31  ;;  %v889_v49 = vadd.f32 %v4318_v27, %v867_v37  ;;  %v890_v50 = vadd.f32 %v4316_v25, %v868_v39  ;;  %v891_v44 = vadd.f32 %v4318_v27, %v869_v40  ;;  %v871_v62 = vld [vmem:[#allocation2 + $0x48] sm:$0xff]  ;;  %v872_v63 = vld [vmem:[#allocation2 + $0x50] sm:$0xff]  ;;  %v873_v1 = vld [vmem:[#allocation2 + $0x58] sm:$0xff] }
 0x129   : > { %v900_v45 = vmax.f32 %v884_v42, 0.0  ;;  %v901_v51 = vmax.f32 %v885_v33, 0.0  ;;  %v902_v52 = vmax.f32 %v886_v26, 0.0  ;;  %v903_v54 = vmax.f32 %v887_v47, 0.0  ;;  %v3961_v4 = vld [vmem:[%s5078_s3 + $0xc8] sm:$0xff]  ;;  %v3948_v11 = vld [vmem:[%s5078_s3 + $0x60] sm:$0xff] }
 0x12a   : > { %v904_v56 = vmax.f32 %v888_v48, 0.0  ;;  %v905_v57 = vmax.f32 %v889_v49, 0.0  ;;  %v906_v58 = vmax.f32 %v890_v50, 0.0  ;;  %1128 = vmatpush.bf16.msra.mxu0 %v3950_v29  ;;  %1253 = vmatpush.bf16.msra.mxu2 %v3941_v30  ;;  %v907_v60 = vmax.f32 %v891_v44, 0.0  ;;  %v3939_v12 = vld [vmem:[%s5078_s3 + $0x18] sm:$0xff]  ;;  %v3960_v22 = vld [vmem:[%s5078_s3 + $0xc0] sm:$0xff] }
 0x12b   : > { %v916_v35 = vpack.c.bf16 %v901_v51, %v900_v45  ;;  %v917_v32 = vpack.c.bf16 %v903_v54, %v902_v52  ;;  %v892_v2 = vadd.f32 %v4316_v25, %v870_v61  ;;  %v893_v3 = vadd.f32 %v4318_v27, %v871_v62  ;;  %1411 = vmatpush.bf16.msrb.mxu1 %v3961_v4  ;;  %v3947_v24 = vld [vmem:[%s5078_s3 + $0x58] sm:$0xff]  ;;  %v3938_v28 = vld [vmem:[%s5078_s3 + $0x10] sm:$0xff]  ;;  %v3937_v39 = vld [vmem:[%s5078_s3 + $0x8] sm:$0xff] }
 0x12c   : > { %v918_v0 = vpack.c.bf16 %v905_v57, %v904_v56  ;;  %v919_v6 = vpack.c.bf16 %v907_v60, %v906_v58  ;;  %v894_v7 = vadd.f32 %v4316_v25, %v872_v63  ;;  %v895_v15 = vadd.f32 %v4318_v27, %v873_v1  ;;  %v3946_v37 = vld [vmem:[%s5078_s3 + $0x50] sm:$0xff]  ;;  %v875_v51 = vld [vmem:[#allocation2 + $0x68] sm:$0xff]  ;;  %v876_v52 = vld [vmem:[#allocation2 + $0x70] sm:$0xff] }
 0x12d   : > { %v969_v5 = vunpack.c.l.b16 %v916_v35  ;;  %v970_v38 = vunpack.c.h.b16 %v916_v35  ;;  %v971_v8 = vunpack.c.l.b16 %v917_v32  ;;  %v972_v9 = vunpack.c.h.b16 %v917_v32  ;;  %v874_v48 = vld [vmem:[#allocation2 + $0x60] sm:$0xff]  ;;  %v3945_v35 = vld [vmem:[%s5078_s3 + $0x48] sm:$0xff]  ;;  %v3936_v60 = vld [vmem:[%s5078_s3] sm:$0xff] }
 0x12e   : > { %v974_v36 = vunpack.c.h.b16 %v918_v0  ;;  %v973_v10 = vunpack.c.l.b16 %v918_v0  ;;  %1129 = vmatpush.bf16.msra.mxu0 %v3949_v53  ;;  %1254 = vmatpush.bf16.msra.mxu2 %v3940_v55  ;;  %v976_v13 = vunpack.c.h.b16 %v919_v6  ;;  %v975_v14 = vunpack.c.l.b16 %v919_v6  ;;  %v877_v53 = vld [vmem:[#allocation2 + $0x78] sm:$0xff]  ;;  %v3959_v55 = vld [vmem:[%s5078_s3 + $0xb8] sm:$0xff] }
 0x12f   : > { %v908_v41 = vmax.f32 %v892_v2, 0.0  ;;  %v4359_v16 = vpack.c.b16 %v971_v8, %v969_v5  ;;  %v4361_v17 = vpack.c.b16 %v972_v9, %v970_v38  ;;  %v909_v43 = vmax.f32 %v893_v3, 0.0  ;;  %1412 = vmatpush.bf16.msrb.mxu1 %v3960_v22  ;;  %v3969_v6 = vld [vmem:[%s5078_s3 + $0x108] sm:$0xff] }
 0x130   : > { %v910_v46 = vmax.f32 %v894_v7, 0.0  ;;  %v4363_v34 = vpack.c.b16 %v976_v13, %v974_v36  ;;  %v911_v18 = vmax.f32 %v895_v15, 0.0  ;;  %v4373_v21 = vpack.c.b16 %v975_v14, %v973_v10  ;;  %v3958_v10 = vld [vmem:[%s5078_s3 + $0xb0] sm:$0xff] }
 0x131   : > { %3368 = vmatmul.msk.bf16.vlgmr.msra.gmra.mxu3 %vm842_vm2, %v4361_v17  ;;  %v4368_v19 = vshrl.u32 %v4361_v17, 16  ;;  %v4371_v20 = vshll.u32 %v4361_v17, 16  ;;  %v4388_v29 = vshll.u32 %v4359_v16, 16  ;;  %v920_v30 = vpack.c.bf16 %v909_v43, %v908_v41 }
 0x132   : > { %1130 = vmatpush.bf16.msra.mxu0 %v3948_v11  ;;  %1255 = vmatpush.bf16.msra.mxu2 %v3939_v12  ;;  %v4379_v23 = vshll.u32 %v4363_v34, 16  ;;  %v921_v31 = vpack.c.bf16 %v911_v18, %v910_v46  ;;  %v4400_v49 = vshrl.u32 %v4359_v16, 16  ;;  %v4404_v45 = vshll.u32 %v4373_v21, 16  ;;  %v3968_v12 = vld [vmem:[%s5078_s3 + $0x100] sm:$0xff]  ;;  %v3967_v46 = vld [vmem:[%s5078_s3 + $0xf8] sm:$0xff]  ;;  %v3957_v18 = vld [vmem:[%s5078_s3 + $0xa8] sm:$0xff] }
 0x133   : > { %v1011_v42 = vrot.slane %v4371_v20, 1  ;;  %v978_v40 = vunpack.c.h.b16 %v920_v30  ;;  %v999_v50 = vrot.slane %v4388_v29, 1  ;;  %v896_v54 = vadd.f32 %v4316_v25, %v874_v48  ;;  %1413 = vmatpush.bf16.msrb.mxu1 %v3959_v55  ;;  %v3964_v55 = vld [vmem:[%s5078_s3 + $0xe0] sm:$0xff] }
 0x134   : > { %v1016_v33 = vrot.slane %v4379_v23, 1  ;;  %v980_v47 = vunpack.c.h.b16 %v921_v31  ;;  %v897_v57 = vadd.f32 %v4318_v27, %v875_v51  ;;  %v898_v58 = vadd.f32 %v4316_v25, %v876_v52  ;;  %v3971_v25 = vld [vmem:[%s5078_s3 + $0x118] sm:$0xff]  ;;  %v3954_v52 = vld [vmem:[%s5078_s3 + $0x90] sm:$0xff] }
 0x135   : > { %v1012_v26 = vor.u32 %v1011_v42, %v4368_v19  ;;  %v899_v59 = vadd.f32 %v4318_v27, %v877_v53  ;;  %v1000_v61 = vor.u32 %v999_v50, %v4400_v49  ;;  %v1004_v62 = vrot.slane %v4404_v45, 1  ;;  %v3970_v27 = vld [vmem:[%s5078_s3 + $0x110] sm:$0xff]  ;;  %v3965_v50 = vld [vmem:[%s5078_s3 + $0xe8] sm:$0xff] }
 0x136   : > { %1131 = vmatpush.bf16.msra.mxu0 %v3947_v24  ;;  %1256 = vmatpush.bf16.msra.mxu2 %v3938_v28  ;;  %v4412_v56 = vpack.c.b16 %v980_v47, %v978_v40  ;;  %v4432_v63 = vshrl.u32 %v4363_v34, 16  ;;  %v912_v32 = vmax.f32 %v896_v54, 0.0  ;;  %v913_v1 = vmax.f32 %v897_v57, 0.0  ;;  %v3956_v24 = vld [vmem:[%s5078_s3 + $0xa0] sm:$0xff]  ;;  %v3955_v40 = vld [vmem:[%s5078_s3 + $0x98] sm:$0xff] }
 0x137   : > { %v1017_v44 = vsel %vm993_vm3, %v1012_v26, %v1016_v33  ;;  %v914_v2 = vmax.f32 %v898_v58, 0.0  ;;  %v915_v3 = vmax.f32 %v899_v59, 0.0  ;;  %v1005_v4 = vsel %vm993_vm3, %v1000_v61, %v1004_v62  ;;  %1414 = vmatpush.bf16.msrb.mxu1 %v3958_v10  ;;  %v3963_v61 = vld [vmem:[%s5078_s3 + $0xd8] sm:$0xff] }
 0x138   : > { %3328 = vmatmul.msk.bf16.vlgmr.msra.gmra.mxu1 %vm842_vm2, %v1017_v44  ;;  %v4435_v0 = vshll.u32 %v4412_v56, 16  ;;  %v977_v5 = vunpack.c.l.b16 %v920_v30  ;;  %v979_v38 = vunpack.c.l.b16 %v921_v31  ;;  %v1028_v7 = vor.u32 %v4432_v63, %v1016_v33  ;;  %v3966_v31 = vld [vmem:[%s5078_s3 + $0xf0] sm:$0xff] }
 0x139   : > { %v922_v9 = vpack.c.bf16 %v913_v1, %v912_v32  ;;  %v923_v36 = vpack.c.bf16 %v915_v3, %v914_v2  ;;  %v4456_v41 = vshrl.u32 %v4373_v21, 16  ;;  %v4479_v42 = vshrl.u32 %v4412_v56, 16  ;;  %v3979_v32 = vld [vmem:[%s5078_s3 + $0x158] sm:$0xff]  ;;  %v3988_v1 = vld [vmem:[%s5078_s3 + $0x1a0] sm:$0xff] }
 0x13a   : > { %1132 = vmatpush.bf16.msra.mxu0 %v3946_v37  ;;  %1257 = vmatpush.bf16.msra.mxu2 %v3937_v39  ;;  %v1032_v8 = vrot.slane %v4435_v0, 1  ;;  %v4449_v11 = vpack.c.b16 %v979_v38, %v977_v5  ;;  %v1330_v3 = vrot.slane %v4361_v17, 1 }
 0x13b   : > { %v982_v14 = vunpack.c.h.b16 %v922_v9  ;;  %v984_v15 = vunpack.c.h.b16 %v923_v36  ;;  %1415 = vmatpush.bf16.msrb.mxu1 %v3957_v18  ;;  %v1020_v28 = vor.u32 %v4456_v41, %v1004_v62  ;;  %v981_v37 = vunpack.c.l.b16 %v922_v9  ;;  %v3980_v62 = vld [vmem:[%s5078_s3 + $0x160] sm:$0xff]  ;;  %v3978_v9 = vld [vmem:[%s5078_s3 + $0x150] sm:$0xff] }
 0x13c   : > { %v1033_v13 = vsel %vm993_vm3, %v1028_v7, %v1032_v8  ;;  %v4459_v43 = vshll.u32 %v4449_v11, 16  ;;  %v983_v39 = vunpack.c.l.b16 %v923_v36  ;;  %v1044_v47 = vor.u32 %v4479_v42, %v1032_v8  ;;  %1796 = vmatpush.bf16.msra.mxu3 %v3980_v62  ;;  %v3987_v36 = vld [vmem:[%s5078_s3 + $0x198] sm:$0xff] }
 0x13d   : > { %v4468_v22 = vpack.c.b16 %v984_v15, %v982_v14  ;;  %v4503_v44 = vshrl.u32 %v4449_v11, 16  ;;  %v1183_v59 = vpack.c.b16 %v982_v14, %v982_v14  ;;  %v1327_v7 = vrot.slane %v4359_v16, 1 }
 0x13e   : > { %1133 = vmatpush.bf16.msra.mxu0 %v3945_v35  ;;  %1258 = vmatpush.bf16.msra.mxu2 %v3936_v60  ;;  %v1024_v30 = vrot.slane %v4459_v43, 1  ;;  %v4496_v51 = vpack.c.b16 %v983_v39, %v981_v37  ;;  %v1328_v8 = vrot.slane %v4373_v21, 1  ;;  %v1497_v14 = vrot.slane %v4456_v41, 1 }
 0x13f   : > { %v4482_v33 = vshll.u32 %v4468_v22, 16  ;;  %1416 = vmatpush.bf16.msrb.mxu1 %v3956_v24  ;;  %v4516_v60 = vshrl.u32 %v4468_v22, 16  ;;  %v1498_v15 = vrot.slane %v4404_v45, 2  ;;  %v1502_v18 = vrot.slane %v4371_v20, 2 }
 0x140   : > { %v1025_v26 = vsel %vm993_vm3, %v1020_v28, %v1024_v30  ;;  %v4506_v54 = vshll.u32 %v4496_v51, 16  ;;  %v1036_v57 = vor.u32 %v4503_v44, %v1024_v30  ;;  %v4538_v2 = vshrl.u32 %v4496_v51, 16  ;;  %v3977_v30 = vld [vmem:[%s5078_s3 + $0x148] sm:$0xff] }
 0x141   : > { %3369 = vmatmul.msk.bf16.gmra.mxu3 %vm842_vm2, %v4363_v34  ;;  %1134 = vmatmul.bf16.vlgmr.msra.gmra.mxu0 %v1005_v4  ;;  %v1048_v48 = vrot.slane %v4482_v33, 1  ;;  %v1331_v4 = vrot.slane %v4363_v34, 1  ;;  %v1329_v10 = vsel %vm1326_vm4, %v1327_v7, %v1328_v8  ;;  %v1504_v24 = vrot.slane %v4432_v63, 1 }
 0x142   : > { %1629 = vmatpush.bf16.msrb.mxu2 %v3971_v25  ;;  %1594 = vmatpush.bf16.msrb.mxu0 %v3970_v27  ;;  %v1040_v58 = vrot.slane %v4506_v54, 1  ;;  %v3989_v25 = vld [vmem:[%s5078_s3 + $0x1a8] sm:$0xff]  ;;  %v1505_v28 = vrot.slane %v4379_v23, 2  ;;  %v1499_v39 = vor.u32 %v1498_v15, %v1497_v14  ;;  %v1513_v62 = vrot.slane %v4435_v0, 2 }
 0x143   : > { %1259 = vmatmul.bf16.vlgmr.msra.gmra.mxu2 %v4359_v16  ;;  %1417 = vmatpush.bf16.msrb.mxu1 %v3955_v40  ;;  %v1049_v53 = vsel %vm993_vm3, %v1044_v47, %v1048_v48  ;;  %v1055_v27 = vor.u32 %v4516_v60, %v1048_v48  ;;  %v1332_v38 = vsel %vm1326_vm4, %v1330_v3, %v1331_v4  ;;  %v1520_v14 = vrot.slane %v4516_v60, 1 }
 0x144   : > { %v1041_v35 = vsel %vm993_vm3, %v1036_v57, %v1040_v58  ;;  %v1052_v5 = vor.u32 %v4538_v2, %v1040_v58  ;;  %v1506_v47 = vor.u32 %v1505_v28, %v1504_v24  ;;  %v3985_v57 = vld [vmem:[%s5078_s3 + $0x188] sm:$0xff]  ;;  %v1521_v15 = vrot.slane %v4482_v33, 2 }
 0x146   : > { %1595 = vmatpush.bf16.msrb.mxu0 %v3969_v6  ;;  %1979 = vmatpush.bf16.msra.mxu2 %v3989_v25  ;;  %v1182_v6 = vpack.c.b16 %v981_v37, %v981_v37  ;;  %v3975_v25 = vld [vmem:[%s5078_s3 + $0x138] sm:$0xff]  ;;  %v1522_v24 = vor.u32 %v1521_v15, %v1520_v14 }
 0x147   : > { %1418 = vmatpush.bf16.msrb.mxu1 %v3954_v52 }
 0x148   : > { %3329 = vmatmul.msk.bf16.gmra.mxu1 %vm842_vm2, %v1033_v13  ;;  %v1495_v13 = vrot.slane %v4388_v29, 2 }
 0x14a   : > { %1596 = vmatpush.bf16.msrb.mxu0 %v3968_v12  ;;  %v1494_v12 = vrot.slane %v4400_v49, 1 }
 0x14b   : > { %1761 = vmatpush.bf16.msra.mxu1 %v3979_v32  ;;  %v3974_v32 = vld [vmem:[%s5078_s3 + $0x130] sm:$0xff] }
 0x14c   : > { %v1496_v37 = vor.u32 %v1495_v13, %v1494_v12  ;;  %v1516_v12 = vrot.slane %v4538_v2, 1  ;;  %v1517_v13 = vrot.slane %v4506_v54, 2 }
 0x14e   : > { %1597 = vmatpush.bf16.msrb.mxu0 %v3967_v46  ;;  %v1501_v46 = vrot.slane %v4368_v19, 1 }
 0x14f   : > { %1762 = vmatpush.bf16.msra.mxu1 %v3978_v9  ;;  %v3983_v9 = vld [vmem:[%s5078_s3 + $0x178] sm:$0xff] }
 0x150   : > { %v1503_v40 = vor.u32 %v1502_v18, %v1501_v46  ;;  %v3982_v46 = vld [vmem:[%s5078_s3 + $0x170] sm:$0xff]  ;;  %v1518_v18 = vor.u32 %v1517_v13, %v1516_v12 }
 0x151   : > { %3370 = vmatmul.msk.bf16.gmra.mxu3 %vm842_vm2, %v4412_v56  ;;  %1139 = vmatmul.bf16.gmra.mxu0 %v1025_v26  ;;  %v1335_v26 = vrot.slane %v4412_v56, 1 }
 0x152   : > { %1598 = vmatpush.bf16.msrb.mxu0 %v3966_v31  ;;  %v3986_v31 = vld [vmem:[%s5078_s3 + $0x190] sm:$0xff]  ;;  %v1507_v52 = vsel %vm1493_vm5, %v1503_v40, %v1506_v47 }
 0x153   : > { %1264 = vmatmul.bf16.gmra.mxu2 %v4373_v21  ;;  %1763 = vmatpush.bf16.msra.mxu1 %v3977_v30  ;;  %v1336_v48 = vsel %vm1326_vm4, %v1331_v4, %v1335_v26  ;;  %v4006_v40 = vld [vmem:[%s5078_s3 + $0x230] sm:$0xff] }
 0x156   : > { %1599 = vmatpush.bf16.msrb.mxu0 %v3965_v50  ;;  %v1500_v50 = vsel %vm1493_vm5, %v1496_v37, %v1499_v39  ;;  %v4007_v37 = vld [vmem:[%s5078_s3 + $0x238] sm:$0xff] }
 0x158   : > { %3330 = vmatmul.msk.bf16.gmra.mxu1 %vm842_vm2, %v1049_v53  ;;  %v1333_v53 = vrot.slane %v4449_v11, 1 }
 0x15a   : > { %1600 = vmatpush.bf16.msrb.mxu0 %v3964_v55  ;;  %v3976_v55 = vld [vmem:[%s5078_s3 + $0x140] sm:$0xff]  ;;  %v1334_v58 = vsel %vm1326_vm4, %v1328_v8, %v1333_v53  ;;  %v1337_v8 = vrot.slane %v4496_v51, 1 }
 0x15b   : > { %1764 = vmatpush.bf16.msra.mxu1 %v3976_v55  ;;  %v3996_v55 = vld [vmem:[%s5078_s3 + $0x1e0] sm:$0xff] }
 0x15e   : > { %1601 = vmatpush.bf16.msrb.mxu0 %v3963_v61  ;;  %v1512_v61 = vrot.slane %v4479_v42, 1 }
 0x15f   : > { %1765 = vmatpush.bf16.msra.mxu1 %v3975_v25  ;;  %v1847_v25 = vrot.slane %v4456_v41, 2 }
 0x160   : > { %v1514_v4 = vor.u32 %v1513_v62, %v1512_v61  ;;  %v1844_v61 = vrot.slane %v4400_v49, 2  ;;  %v1845_v62 = vrot.slane %v4388_v29, 3 }
 0x161   : > { %3371 = vmatmul.msk.bf16.gmra.mxu3 %vm842_vm2, %v1183_v59  ;;  %1144 = vmatmul.bf16.gmra.mxu0 %v1041_v35  ;;  %v1508_v59 = vrot.slane %v4503_v44, 1  ;;  %v1509_v35 = vrot.slane %v4459_v43, 2 }
 0x162   : > { %1944 = vmatpush.bf16.msra.mxu0 %v3988_v1  ;;  %v1339_v1 = vrot.slane %v4468_v22, 1  ;;  %v1515_v7 = vsel %vm1493_vm5, %v1506_v47, %v1514_v4  ;;  %v1523_v30 = vsel %vm1493_vm5, %v1514_v4, %v1522_v24  ;;  %v1680_v47 = vrot.slane %v4361_v17, 2 }
 0x163   : > { %1269 = vmatmul.bf16.gmra.mxu2 %v4449_v11  ;;  %v1510_v3 = vor.u32 %v1509_v35, %v1508_v59  ;;  %1766 = vmatpush.bf16.msra.mxu1 %v3974_v32  ;;  %v1851_v32 = vrot.slane %v4368_v19, 2  ;;  %v1855_v4 = vrot.slane %v4379_v23, 3 }
 0x165   : > { %v1519_v28 = vsel %vm1493_vm5, %v1510_v3, %v1518_v18 }
 0x166   : > { %1945 = vmatpush.bf16.msra.mxu0 %v3987_v36  ;;  %v3972_v36 = vld [vmem:[%s5078_s3 + $0x120] sm:$0xff] }
 0x168   : > { %3331 = vmatmul.msk.bf16.gmra.mxu1 %vm842_vm2, %v1055_v27  ;;  %v3984_v27 = vld [vmem:[%s5078_s3 + $0x180] sm:$0xff] }
 0x16a   : > { %1946 = vmatpush.bf16.msra.mxu0 %v3986_v31  ;;  %v3981_v31 = vld [vmem:[%s5078_s3 + $0x168] sm:$0xff] }
 0x16e   : > { %1947 = vmatpush.bf16.msra.mxu0 %v3985_v57  ;;  %v4005_v57 = vld [vmem:[%s5078_s3 + $0x228] sm:$0xff] }
 0x171   : > { %3426 = vmatmul.msk.bf16.vlgmr.msrb.gmra.mxu3 %vm842_vm2, %v1332_v38  ;;  %1149 = vmatmul.bf16.gmra.mxu0 %v1052_v5  ;;  %v1340_v5 = vsel %vm1326_vm4, %v1335_v26, %v1339_v1  ;;  %v1511_v38 = vsel %vm1493_vm5, %v1499_v39, %v1510_v3  ;;  %v3998_v26 = vld [vmem:[%s5078_s3 + $0x1f0] sm:$0xff]  ;;  %v3997_v39 = vld [vmem:[%s5078_s3 + $0x1e8] sm:$0xff]  ;;  %v1854_v3 = vrot.slane %v4432_v63, 2 }
 0x172   : > { %1948 = vmatpush.bf16.msra.mxu0 %v3984_v27  ;;  %2146 = vmatpush.bf16.msrb.mxu3 %v3998_v26  ;;  %v1848_v27 = vrot.slane %v4404_v45, 3 }
 0x173   : > { %1274 = vmatmul.bf16.gmra.mxu2 %v1182_v6  ;;  %v3973_v6 = vld [vmem:[%s5078_s3 + $0x128] sm:$0xff] }
 0x174   : > { %1767 = vmatpush.bf16.msra.mxu1 %v3973_v6  ;;  %v1685_v6 = vrot.slane %v4412_v56, 2 }
 0x176   : > { %1949 = vmatpush.bf16.msra.mxu0 %v3983_v9 }
 0x178   : > { %1419 = vmatmul.bf16.vlgmr.msrb.gmra.mxu1 %v1329_v10  ;;  %v1338_v10 = vsel %vm1326_vm4, %v1333_v53, %v1337_v8  ;;  %v1678_v53 = vrot.slane %v4373_v21, 2 }
 0x179   : > { %1768 = vmatpush.bf16.msra.mxu1 %v3972_v36  ;;  %v1856_v36 = vor.u32 %v1855_v4, %v1854_v3 }
 0x17a   : > { %1950 = vmatpush.bf16.msra.mxu0 %v3982_v46 }
 0x17d   : > { %2111 = vmatpush.bf16.msrb.mxu1 %v3997_v39 }
 0x17e   : > { %1951 = vmatpush.bf16.msra.mxu0 %v3981_v31 }
 0x181   : > { %3427 = vmatmul.msk.bf16.gmra.mxu3 %vm842_vm2, %v1336_v48  ;;  %1602 = vmatmul.bf16.vlgmr.msrb.gmra.mxu0 %v1500_v50  ;;  %v1681_v48 = vrot.slane %v4363_v34, 2 }
 0x182   : > { %2294 = vmatpush.bf16.msrb.mxu0 %v4006_v40  ;;  %2112 = vmatpush.bf16.msrb.mxu1 %v3996_v55  ;;  %v1862_v55 = vrot.slane %v4479_v42, 2 }
 0x183   : > { %3484 = vmatmul.msk.bf16.vlgmr.msrb.gmra.mxu2 %vm842_vm2, %v1507_v52  ;;  %v1682_v50 = vsel %vm1676_vm6, %v1680_v47, %v1681_v48  ;;  %v1677_v52 = vrot.slane %v4359_v16, 2  ;;  %v1686_v13 = vsel %vm1676_vm6, %v1681_v48, %v1685_v6  ;;  %v1858_v48 = vrot.slane %v4503_v44, 2 }
 0x184   : > { %2329 = vmatpush.bf16.msrb.mxu2 %v4007_v37 }
 0x185   : > { %v1679_v35 = vsel %vm1676_vm6, %v1677_v52, %v1678_v53 }
 0x186   : > { %2295 = vmatpush.bf16.msrb.mxu0 %v4005_v57  ;;  %v1863_v57 = vrot.slane %v4435_v0, 3 }
 0x188   : > { %1424 = vmatmul.bf16.gmra.mxu1 %v1334_v58 }
 0x191   : > { %3428 = vmatmul.msk.bf16.gmra.mxu3 %vm842_vm2, %v1340_v5  ;;  %1607 = vmatmul.bf16.gmra.mxu0 %v1511_v38  ;;  %v3995_v5 = vld [vmem:[%s5078_s3 + $0x1d8] sm:$0xff]  ;;  %v4004_v38 = vld [vmem:[%s5078_s3 + $0x220] sm:$0xff] }
 0x192   : > { %2113 = vmatpush.bf16.msrb.mxu1 %v3995_v5  ;;  %2296 = vmatpush.bf16.msrb.mxu0 %v4004_v38 }
 0x193   : > { %3485 = vmatmul.msk.bf16.gmra.mxu2 %vm842_vm2, %v1515_v7  ;;  %v1846_v7 = vor.u32 %v1845_v62, %v1844_v61  ;;  %v1689_v61 = vrot.slane %v4468_v22, 2 }
 0x195   : > { %v1690_v4 = vsel %vm1676_vm6, %v1685_v6, %v1689_v61  ;;  %v4001_v6 = vld [vmem:[%s5078_s3 + $0x208] sm:$0xff] }
 0x198   : > { %1429 = vmatmul.bf16.gmra.mxu1 %v1338_v10 }
 0x1a1   : > { %3429 = vmatmul.msk.bf16.gmra.mxu3 %vm842_vm2, %v1339_v1  ;;  %1612 = vmatmul.bf16.gmra.mxu0 %v1519_v28  ;;  %v1852_v1 = vrot.slane %v4371_v20, 3  ;;  %v3994_v28 = vld [vmem:[%s5078_s3 + $0x1d0] sm:$0xff] }
 0x1a2   : > { %2114 = vmatpush.bf16.msrb.mxu1 %v3994_v28 }
 0x1a3   : > { %3486 = vmatmul.msk.bf16.gmra.mxu2 %vm842_vm2, %v1523_v30  ;;  %v1853_v9 = vor.u32 %v1852_v1, %v1851_v32  ;;  %v4003_v30 = vld [vmem:[%s5078_s3 + $0x218] sm:$0xff] }
 0x1a4   : > { %2297 = vmatpush.bf16.msrb.mxu0 %v4003_v30  ;;  %v1866_v30 = vrot.slane %v4538_v2, 2 }
 0x1a8   : > { %1434 = vmatmul.bf16.gmra.mxu1 %v1337_v8  ;;  %v1849_v8 = vor.u32 %v1848_v27, %v1847_v25  ;;  %v1864_v25 = vor.u32 %v1863_v57, %v1862_v55  ;;  %v3992_v27 = vld [vmem:[%s5078_s3 + $0x1c0] sm:$0xff] }
 0x1aa   : > { %v1850_v15 = vsel %vm1843_vm7, %v1846_v7, %v1849_v8 }
 0x1b1   : > { %3542 = vmatmul.msk.bf16.vlgmr.msra.gmra.mxu3 %vm842_vm2, %v1682_v50  ;;  %1617 = vmatmul.bf16.gmra.mxu0 %v1518_v18  ;;  %v1857_v18 = vsel %vm1843_vm7, %v1853_v9, %v1856_v36  ;;  %v1859_v50 = vrot.slane %v4459_v43, 3  ;;  %v1865_v9 = vsel %vm1843_vm7, %v1856_v36, %v1864_v25 }
 0x1b3   : > { %3487 = vmatmul.msk.bf16.gmra.mxu2 %vm842_vm2, %v1522_v24  ;;  %v1683_v24 = vrot.slane %v4449_v11, 2  ;;  %v1860_v62 = vor.u32 %v1859_v50, %v1858_v48 }
 0x1b4   : > { %v1288_v58 = vpop.f32.mrf.mxu3 }
 0x1b5   : > { %v1163_v59 = vpop.f32.mrf.mxu1  ;;  %v1684_v37 = vsel %vm1676_vm6, %v1678_v53, %v1683_v24  ;;  %v4002_v53 = vld [vmem:[%s5078_s3 + $0x210] sm:$0xff]  ;;  %v1861_v38 = vsel %vm1843_vm7, %v1849_v8, %v1860_v62 }
 0x1b6   : > { %2298 = vmatpush.bf16.msrb.mxu0 %v4002_v53  ;;  %v3990_v8 = vld [vmem:[%s5078_s3 + $0x1b0] sm:$0xff] }
 0x1b8   : > { %1769 = vmatmul.bf16.vlgmr.msra.gmra.mxu1 %v1679_v35 }
 0x1ba   : > { %2299 = vmatpush.bf16.msrb.mxu0 %v4001_v6 }
 0x1bc   : > { %v1290_v10 = vpop.f32.mrf.mxu3 }
 0x1bd   : > { %v1165_v12 = vpop.f32.mrf.mxu1 }
 0x1be   : > { %v1135_v14 = vpop.f32.mrf.mxu0 }
 0x1bf   : > { %v1164_v46 = vadd.f32 %v1163_v59, %v1135_v14  ;;  %v3993_v59 = vld [vmem:[%s5078_s3 + $0x1c8] sm:$0xff]  ;;  %v1687_v14 = vrot.slane %v4496_v51, 2 }
 0x1c0   : > { %2115 = vmatpush.bf16.msrb.mxu1 %v3993_v59 }
 0x1c1   : > { %3543 = vmatmul.msk.bf16.gmra.mxu3 %vm842_vm2, %v1686_v13  ;;  %1952 = vmatmul.bf16.vlgmr.msra.gmra.mxu0 %v1850_v15  ;;  %v1688_v15 = vsel %vm1676_vm6, %v1683_v24, %v1687_v14  ;;  %v4000_v24 = vld [vmem:[%s5078_s3 + $0x200] sm:$0xff] }
 0x1c2   : > { %2300 = vmatpush.bf16.msrb.mxu0 %v4000_v24 }
 0x1c3   : > { %3600 = vmatmul.msk.bf16.vlgmr.msra.gmra.mxu2 %vm842_vm2, %v1857_v18 }
 0x1c4   : > { %v1293_v31 = vpop.f32.mrf.mxu3  ;;  %2116 = vmatpush.bf16.msrb.mxu1 %v3992_v27 }
 0x1c5   : > { %v1168_v26 = vpop.f32.mrf.mxu1 }
 0x1c6   : > { %v1260_v39 = vpop.f32.mrf.mxu2  ;;  %v1137_v47 = vpop.f32.mrf.mxu0 }
 0x1c7   : > { %v1261_v40 = vadd.f32 %v1260_v39, %v1164_v46  ;;  %v1166_v52 = vadd.f32 %v1165_v12, %v1137_v47  ;;  %v3991_v12 = vld [vmem:[%s5078_s3 + $0x1b8] sm:$0xff]  ;;  %v1870_v39 = vrot.slane %v4516_v60, 2 }
 0x1c8   : > { %1774 = vmatmul.bf16.gmra.mxu1 %v1684_v37 }
 0x1c9   : > { %v4687_v35 = vadd.f32 %v1288_v58, %v1261_v40  ;;  %2117 = vmatpush.bf16.msrb.mxu1 %v3991_v12  ;;  %v1871_v40 = vrot.slane %v4482_v33, 3  ;;  %v2031_v12 = vrot.slane %v4363_v34, 3 }
 0x1cb   : > { %v1872_v50 = vor.u32 %v1871_v40, %v1870_v39  ;;  %v2195_v39 = vrot.slane %v4388_v29, 4  ;;  %v2035_v29 = vrot.slane %v4412_v56, 3  ;;  %v2033_v56 = vrot.slane %v4449_v11, 3 }
 0x1cc   : > { %v1295_v32 = vpop.f32.mrf.mxu3 }
 0x1cd   : > { %v1170_v1 = vpop.f32.mrf.mxu1  ;;  %2118 = vmatpush.bf16.msrb.mxu1 %v3990_v8 }
 0x1ce   : > { %v1262_v3 = vpop.f32.mrf.mxu2  ;;  %v1140_v5 = vpop.f32.mrf.mxu0 }
 0x1cf   : > { %v1263_v58 = vadd.f32 %v1262_v3, %v1166_v52  ;;  %v1169_v7 = vadd.f32 %v1168_v26, %v1140_v5  ;;  %v1867_v26 = vrot.slane %v4506_v54, 3  ;;  %v1873_v3 = vsel %vm1843_vm7, %v1864_v25, %v1872_v50 }
 0x1d1   : > { %v4702_v13 = vadd.f32 %v1290_v10, %v1263_v58  ;;  %3544 = vmatmul.msk.bf16.gmra.mxu3 %vm842_vm2, %v1690_v4  ;;  %1957 = vmatmul.bf16.gmra.mxu0 %v1861_v38  ;;  %v1868_v48 = vor.u32 %v1867_v26, %v1866_v30 }
 0x1d3   : > { %3601 = vmatmul.msk.bf16.gmra.mxu2 %vm842_vm2, %v1865_v9  ;;  %v1869_v27 = vsel %vm1843_vm7, %v1860_v62, %v1868_v48 }
 0x1d4   : > { %v1298_v36 = vpop.f32.mrf.mxu3 }
 0x1d5   : > { %v1173_v10 = vpop.f32.mrf.mxu1 }
 0x1d6   : > { %v1265_v46 = vpop.f32.mrf.mxu2  ;;  %v1142_v28 = vpop.f32.mrf.mxu0 }
 0x1d7   : > { %v1266_v18 = vadd.f32 %v1265_v46, %v1169_v7  ;;  %v1171_v37 = vadd.f32 %v1170_v1, %v1142_v28 }
 0x1d8   : > { %1779 = vmatmul.bf16.gmra.mxu1 %v1688_v15 }
 0x1d9   : > { %v4718_v47 = vadd.f32 %v1293_v31, %v1266_v18  ;;  %v3999_v31 = vld [vmem:[%s5078_s3 + $0x1f8] sm:$0xff] }
 0x1da   : > { %2301 = vmatpush.bf16.msrb.mxu0 %v3999_v31 }
 0x1dc   : > { %v1300_v52 = vpop.f32.mrf.mxu3 }
 0x1dd   : > { %v1175_v55 = vpop.f32.mrf.mxu1 }
 0x1de   : > { %v1267_v57 = vpop.f32.mrf.mxu2  ;;  %v1145_v53 = vpop.f32.mrf.mxu0 }
 0x1df   : > { %v1268_v59 = vadd.f32 %v1267_v57, %v1171_v37  ;;  %v1174_v1 = vadd.f32 %v1173_v10, %v1145_v53  ;;  %v2194_v37 = vrot.slane %v4400_v49, 3  ;;  %v2205_v57 = vrot.slane %v4379_v23, 4 }
 0x1e1   : > { %v4725_v58 = vadd.f32 %v1295_v32, %v1268_v59  ;;  %3545 = vmatmul.msk.bf16.gmra.mxu3 %vm842_vm2, %v1689_v61  ;;  %1962 = vmatmul.bf16.gmra.mxu0 %v1869_v27  ;;  %v2030_v32 = vrot.slane %v4361_v17, 3  ;;  %v2028_v17 = vrot.slane %v4373_v21, 3  ;;  %v2201_v21 = vrot.slane %v4368_v19, 3 }
 0x1e2   : > { %v2196_v53 = vor.u32 %v2195_v39, %v2194_v37 }
 0x1e3   : > { %3602 = vmatmul.msk.bf16.gmra.mxu2 %vm842_vm2, %v1873_v3  ;;  %v2032_v15 = vsel %vm2026_vm8, %v2030_v32, %v2031_v12  ;;  %v2208_v32 = vrot.slane %v4503_v44, 3 }
 0x1e4   : > { %v1303_v4 = vpop.f32.mrf.mxu3 }
 0x1e5   : > { %v1178_v5 = vpop.f32.mrf.mxu1 }
 0x1e6   : > { %v1270_v38 = vpop.f32.mrf.mxu2  ;;  %v1147_v62 = vpop.f32.mrf.mxu0 }
 0x1e7   : > { %v1271_v7 = vadd.f32 %v1270_v38, %v1174_v1  ;;  %v1176_v9 = vadd.f32 %v1175_v55, %v1147_v62  ;;  %v2204_v55 = vrot.slane %v4432_v63, 3  ;;  %v2036_v63 = vsel %vm2026_vm8, %v2031_v12, %v2035_v29 }
 0x1e8   : > { %1784 = vmatmul.bf16.gmra.mxu1 %v1687_v14  ;;  %v2027_v14 = vrot.slane %v4359_v16, 3  ;;  %v2198_v16 = vrot.slane %v4404_v45, 4  ;;  %v2209_v12 = vrot.slane %v4459_v43, 4 }
 0x1e9   : > { %v4732_v25 = vadd.f32 %v1298_v36, %v1271_v7  ;;  %v2206_v45 = vor.u32 %v2205_v57, %v2204_v55 }
 0x1ea   : > { %v2029_v30 = vsel %vm2026_vm8, %v2027_v14, %v2028_v17 }
 0x1ec   : > { %v1305_v6 = vpop.f32.mrf.mxu3 }
 0x1ed   : > { %v1180_v61 = vpop.f32.mrf.mxu1  ;;  %v2212_v6 = vrot.slane %v4479_v42, 3 }
 0x1ee   : > { %v1272_v8 = vpop.f32.mrf.mxu2  ;;  %v1150_v46 = vpop.f32.mrf.mxu0  ;;  %v2213_v61 = vrot.slane %v4435_v0, 4 }
 0x1ef   : > { %v1273_v10 = vadd.f32 %v1272_v8, %v1176_v9  ;;  %v1179_v18 = vadd.f32 %v1178_v5, %v1150_v46  ;;  %v2034_v5 = vsel %vm2026_vm8, %v2028_v17, %v2033_v56 }
 0x1f0   : > { %v2214_v46 = vor.u32 %v2213_v61, %v2212_v6 }
 0x1f1   : > { %v4737_v28 = vadd.f32 %v1300_v52, %v1273_v10  ;;  %3658 = vmatmul.msk.bf16.vlgmr.msrb.gmra.mxu3 %vm842_vm2, %v2032_v15  ;;  %1967 = vmatmul.bf16.gmra.mxu0 %v1868_v48  ;;  %v2197_v48 = vrot.slane %v4456_v41, 3  ;;  %v2039_v10 = vrot.slane %v4468_v22, 3  ;;  %v2210_v15 = vor.u32 %v2209_v12, %v2208_v32 }
 0x1f2   : > { %v2215_v0 = vsel %vm2193_vm9, %v2206_v45, %v2214_v46  ;;  %v2037_v22 = vrot.slane %v4496_v51, 3 }
 0x1f3   : > { %3603 = vmatmul.msk.bf16.gmra.mxu2 %vm842_vm2, %v1872_v50  ;;  %v2202_v50 = vrot.slane %v4371_v20, 4  ;;  %v2199_v27 = vor.u32 %v2198_v16, %v2197_v48  ;;  %v2040_v43 = vsel %vm2026_vm8, %v2035_v29, %v2039_v10  ;;  %v2221_v48 = vrot.slane %v4482_v33, 4 }
 0x1f4   : > { %v1448_v34 = vpop.f32.mrf.mxu3 }
 0x1f5   : > { %v1420_v36 = vpop.f32.mrf.mxu1  ;;  %v2203_v41 = vor.u32 %v2202_v50, %v2201_v21  ;;  %v2211_v42 = vsel %vm2193_vm9, %v2199_v27, %v2210_v15 }
 0x1f6   : > { %v1275_v26 = vpop.f32.mrf.mxu2  ;;  %v1449_v40 = vadd.f32 %v1448_v34, %v1420_v36  ;;  %v1152_v52 = vpop.f32.mrf.mxu0  ;;  %v2038_v36 = vsel %vm2026_vm8, %v2033_v56, %v2037_v22 }
 0x1f7   : > { %v1276_v24 = vadd.f32 %v1275_v26, %v1179_v18  ;;  %v2207_v3 = vsel %vm2193_vm9, %v2203_v41, %v2206_v45  ;;  %v2220_v52 = vrot.slane %v4516_v60, 3 }
 0x1f8   : > { %v1467_v59 = vadd.f32 %v1449_v40, %v4687_v35  ;;  %2119 = vmatmul.bf16.vlgmr.msrb.gmra.mxu1 %v2029_v30  ;;  %v2200_v35 = vsel %vm2193_vm9, %v2196_v53, %v2199_v27  ;;  %v2216_v40 = vrot.slane %v4538_v2, 3 }
 0x1f9   : > { %v4753_v49 = vadd.f32 %v1303_v4, %v1276_v24  ;;  %v2217_v24 = vrot.slane %v4506_v54, 4  ;;  %v2222_v50 = vor.u32 %v2221_v48, %v2220_v52 }
 0x1fb   : > { %v2218_v21 = vor.u32 %v2217_v24, %v2216_v40  ;;  %v2223_v2 = vsel %vm2193_vm9, %v2214_v46, %v2222_v50 }
 0x1fc   : > { %v4756_v1 = vpop.f32.mrf.mxu3 }
 0x1fd   : > { %v4758_v19 = vpop.f32.mrf.mxu1  ;;  %v2219_v53 = vsel %vm2193_vm9, %v2210_v15, %v2218_v21 }
 0x1fe   : > { %v1277_v20 = vpop.f32.mrf.mxu2  ;;  %v1603_v23 = vpop.f32.mrf.mxu0 }
 0x201   : > { %3659 = vmatmul.msk.bf16.gmra.mxu3 %vm842_vm2, %v2036_v63  ;;  %2302 = vmatmul.bf16.vlgmr.msrb.gmra.mxu0 %v2200_v35 }
 0x203   : > { %3716 = vmatmul.msk.bf16.vlgmr.msrb.gmra.mxu2 %vm842_vm2, %v2207_v3 }
 0x204   : > { %v1453_v31 = vpop.f32.mrf.mxu3 }
 0x205   : > { %v1425_v4 = vpop.f32.mrf.mxu1 }
 0x206   : > { %v1631_v38 = vpop.f32.mrf.mxu2  ;;  %v1454_v7 = vadd.f32 %v1453_v31, %v1425_v4  ;;  %v4767_v9 = vpop.f32.mrf.mxu0 }
 0x207   : > { %v1632_v62 = vadd.f32 %v1631_v38, %v1603_v23 }
 0x208   : > { %v1469_v11 = vadd.f32 %v1454_v7, %v4718_v47  ;;  %2124 = vmatmul.bf16.gmra.mxu1 %v2034_v5 }
 0x209   : > { %v1650_v8 = vadd.f32 %v1632_v62, %v1467_v59 }
 0x20c   : > { %v4775_v18 = vpop.f32.mrf.mxu3 }
 0x20d   : > { %v4777_v14 = vpop.f32.mrf.mxu1 }
 0x20e   : > { %v4779_v17 = vpop.f32.mrf.mxu2  ;;  %v1608_v44 = vpop.f32.mrf.mxu0 }
 0x211   : > { %3660 = vmatmul.msk.bf16.gmra.mxu3 %vm842_vm2, %v2040_v43  ;;  %2307 = vmatmul.bf16.gmra.mxu0 %v2211_v42 }
 0x213   : > { %3717 = vmatmul.msk.bf16.gmra.mxu2 %vm842_vm2, %v2215_v0 }
 0x214   : > { %v1458_v47 = vpop.f32.mrf.mxu3 }
 0x215   : > { %v1430_v34 = vpop.f32.mrf.mxu1 }
 0x216   : > { %v1636_v30 = vpop.f32.mrf.mxu2  ;;  %v1459_v26 = vadd.f32 %v1458_v47, %v1430_v34  ;;  %v4788_v39 = vpop.f32.mrf.mxu0 }
 0x217   : > { %v1637_v37 = vadd.f32 %v1636_v30, %v1608_v44 }
 0x218   : > { %v1471_v51 = vadd.f32 %v1459_v26, %v4732_v25  ;;  %2129 = vmatmul.bf16.gmra.mxu1 %v2038_v36  ;;  %v4010_v36 = vld [vmem:[%s5080_s5 + $0x10] sm:$0xff] }
 0x219   : > { %v1652_v16 = vadd.f32 %v1637_v37, %v1469_v11  ;;  %2522 = vmatpush.bf16.msra.mxu3 %v4010_v36 }
 0x21c   : > { %v1460_v55 = vpop.f32.mrf.mxu3 }
 0x21d   : > { %v1432_v57 = vpop.f32.mrf.mxu1 }
 0x21e   : > { %v4795_v59 = vpop.f32.mrf.mxu2  ;;  %v1613_v29 = vpop.f32.mrf.mxu0  ;;  %v1461_v48 = vadd.f32 %v1460_v55, %v1432_v57 }
 0x220   : > { %v1472_v55 = vadd.f32 %v1461_v48, %v4737_v28  ;;  %v1634_v48 = vadd.f32 %v4779_v17, %v4767_v9  ;;  %v4870_v9 = vld [vmem:[%s5079_s4] ss:$0 sm:$0xff] }
 0x221   : > { %3661 = vmatmul.msk.bf16.gmra.mxu3 %vm842_vm2, %v2039_v10  ;;  %2312 = vmatmul.bf16.gmra.mxu0 %v2219_v53 }
 0x223   : > { %3718 = vmatmul.msk.bf16.gmra.mxu2 %vm842_vm2, %v2223_v2 }
 0x224   : > { %v1463_v33 = vpop.f32.mrf.mxu3 }
 0x225   : > { %v1435_v54 = vpop.f32.mrf.mxu1 }
 0x226   : > { %v1641_v60 = vpop.f32.mrf.mxu2  ;;  %v1464_v25 = vadd.f32 %v1463_v33, %v1435_v54  ;;  %v1615_v41 = vpop.f32.mrf.mxu0 }
 0x227   : > { %v1642_v27 = vadd.f32 %v1641_v60, %v1613_v29  ;;  %v4016_v29 = vld [vmem:[%s5080_s5 + $0x40] sm:$0xff] }
 0x228   : > { %v1473_v45 = vadd.f32 %v1464_v25, %v4753_v49  ;;  %2134 = vmatmul.bf16.gmra.mxu1 %v2037_v22  ;;  %2587 = vmatpush.bf16.msra.mxu0 %v4016_v29 }
 0x229   : > { %v1654_v20 = vadd.f32 %v1642_v27, %v1471_v51 }
 0x22c   : > { %v1465_v63 = vpop.f32.mrf.mxu3 }
 0x22d   : > { %v1437_v23 = vpop.f32.mrf.mxu1 }
 0x22e   : > { %v1643_v35 = vpop.f32.mrf.mxu2  ;;  %v1618_v3 = vpop.f32.mrf.mxu0 }
 0x22f   : > { %v1644_v53 = vadd.f32 %v1643_v35, %v1615_v41 }
 0x231   : > { %2317 = vmatmul.bf16.gmra.mxu0 %v2218_v21  ;;  %v4013_v21 = vld [vmem:[%s5080_s5 + $0x28] sm:$0xff]  ;;  %v1655_v54 = vadd.f32 %v1644_v53, %v1472_v55 }
 0x232   : > { %2474 = vmatpush.bf16.msra.mxu1 %v4013_v21 }
 0x233   : > { %3719 = vmatmul.msk.bf16.gmra.mxu2 %vm842_vm2, %v2222_v50  ;;  %v4019_v50 = vld [vmem:[%s5080_s5 + $0x58] sm:$0xff] }
 0x234   : > { %v1798_v56 = vpop.f32.mrf.mxu3  ;;  %2668 = vmatpush.bf16.msra.mxu2 %v4019_v50 }
 0x235   : > { %v1770_v31 = vpop.f32.mrf.mxu1 }
 0x236   : > { %v1646_v4 = vpop.f32.mrf.mxu2  ;;  %v1799_v5 = vadd.f32 %v1798_v56, %v1770_v31  ;;  %v1620_v7 = vpop.f32.mrf.mxu0 }
 0x237   : > { %v1647_v38 = vadd.f32 %v1646_v4, %v1618_v3 }
 0x238   : > { %v1817_v62 = vadd.f32 %v1799_v5, %v1650_v8 }
 0x239   : > { %v1656_v32 = vadd.f32 %v1647_v38, %v1473_v45 }
 0x23c   : > { %v4803_v12 = vpop.f32.mrf.mxu3 }
 0x23d   : > { %v4805_v49 = vpop.f32.mrf.mxu1 }
 0x23e   : > { %v1648_v6 = vpop.f32.mrf.mxu2  ;;  %v1953_v61 = vpop.f32.mrf.mxu0  ;;  %v1801_v53 = vadd.f32 %v4803_v12, %v4805_v49  ;;  %v4017_v12 = vld [vmem:[%s5080_s5 + $0x48] sm:$0xff]  ;;  %v4014_v49 = vld [vmem:[%s5080_s5 + $0x30] sm:$0xff] }
 0x23f   : > { %v4012_v6 = vld [vmem:[%s5080_s5 + $0x20] sm:$0xff] }
 0x240   : > { %2475 = vmatpush.bf16.msra.mxu1 %v4012_v6 }
 0x244   : > { %v1803_v11 = vpop.f32.mrf.mxu3 }
 0x245   : > { %v1775_v10 = vpop.f32.mrf.mxu1 }
 0x246   : > { %v1981_v15 = vpop.f32.mrf.mxu2  ;;  %v1804_v46 = vadd.f32 %v1803_v11, %v1775_v10  ;;  %v4807_v44 = vpop.f32.mrf.mxu0 }
 0x247   : > { %v1982_v43 = vadd.f32 %v1981_v15, %v1953_v61 }
 0x248   : > { %v1819_v42 = vadd.f32 %v1804_v46, %v1652_v16 }
 0x249   : > { %v4809_v0 = vadd.f32 %v1982_v43, %v1817_v62  ;;  %v4009_v62 = vld [vmem:[%s5080_s5 + $0x8] sm:$0xff] }
 0x24a   : > { %2523 = vmatpush.bf16.msra.mxu3 %v4009_v62 }
 0x24c   : > { %v4811_v22 = vpop.f32.mrf.mxu3 }
 0x24d   : > { %v4813_v8 = vpop.f32.mrf.mxu1 }
 0x24e   : > { %v4815_v47 = vpop.f32.mrf.mxu2  ;;  %v1958_v34 = vpop.f32.mrf.mxu0 }
 0x254   : > { %v1808_v30 = vpop.f32.mrf.mxu3 }
 0x255   : > { %v1780_v26 = vpop.f32.mrf.mxu1 }
 0x256   : > { %v1986_v37 = vpop.f32.mrf.mxu2  ;;  %v1809_v40 = vadd.f32 %v1808_v30, %v1780_v26  ;;  %v4820_v52 = vpop.f32.mrf.mxu0 }
 0x257   : > { %v1987_v24 = vadd.f32 %v1986_v37, %v1958_v34  ;;  %v4008_v34 = vld [vmem:[%s5080_s5] sm:$0xff] }
 0x258   : > { %v1821_v51 = vadd.f32 %v1809_v40, %v1654_v20  ;;  %2524 = vmatpush.bf16.msra.mxu3 %v4008_v34  ;;  %v1451_v40 = vadd.f32 %v4756_v1, %v4758_v19  ;;  %v1984_v1 = vadd.f32 %v4815_v47, %v4807_v44 }
 0x259   : > { %v4822_v16 = vadd.f32 %v1987_v24, %v1819_v42  ;;  %v4015_v42 = vld [vmem:[%s5080_s5 + $0x38] sm:$0xff] }
 0x25a   : > { %2588 = vmatpush.bf16.msra.mxu0 %v4015_v42  ;;  %v1468_v29 = vadd.f32 %v1451_v40, %v4702_v13  ;;  %v4011_v13 = vld [vmem:[%s5080_s5 + $0x18] sm:$0xff] }
 0x25b   : > { %2476 = vmatpush.bf16.msra.mxu1 %v4011_v13  ;;  %v4027_v13 = vld [vmem:[%s5080_s5 + $0x98] sm:$0xff] }
 0x25c   : > { %v1810_v57 = vpop.f32.mrf.mxu3 }
 0x25d   : > { %v1782_v2 = vpop.f32.mrf.mxu1 }
 0x25e   : > { %v4834_v33 = vpop.f32.mrf.mxu2  ;;  %v1811_v60 = vadd.f32 %v1810_v57, %v1782_v2  ;;  %v1963_v25 = vpop.f32.mrf.mxu0  ;;  %2589 = vmatpush.bf16.msra.mxu0 %v4014_v49 }
 0x260   : > { %v1822_v27 = vadd.f32 %v1811_v60, %v1655_v54  ;;  %v1651_v54 = vadd.f32 %v1634_v48, %v1468_v29 }
 0x262   : > { %v1818_v17 = vadd.f32 %v1801_v53, %v1651_v54  ;;  %v4028_v53 = vld [vmem:[%s5080_s5 + $0xa0] sm:$0xff] }
 0x263   : > { %2889 = vmatpush.bf16.msrb.mxu0 %v4028_v53 }
 0x264   : > { %v1813_v45 = vpop.f32.mrf.mxu3  ;;  %v2001_v44 = vadd.f32 %v1984_v1, %v1818_v17  ;;  %v4021_v17 = vld [vmem:[%s5080_s5 + $0x68] sm:$0xff] }
 0x265   : > { %v1785_v20 = vpop.f32.mrf.mxu1 }
 0x266   : > { %v1991_v63 = vpop.f32.mrf.mxu2  ;;  %v1814_v23 = vadd.f32 %v1813_v45, %v1785_v20  ;;  %v1965_v56 = vpop.f32.mrf.mxu0 }
 0x267   : > { %v1992_v3 = vadd.f32 %v1991_v63, %v1963_v25  ;;  %2890 = vmatpush.bf16.msrb.mxu0 %v4027_v13 }
 0x268   : > { %v1823_v41 = vadd.f32 %v1814_v23, %v1656_v32  ;;  %v4018_v32 = vld [vmem:[%s5080_s5 + $0x50] sm:$0xff] }
 0x269   : > { %v4836_v35 = vadd.f32 %v1992_v3, %v1821_v51  ;;  %2669 = vmatpush.bf16.msra.mxu2 %v4018_v32 }
 0x26c   : > { %v1815_v31 = vpop.f32.mrf.mxu3 }
 0x26d   : > { %v1787_v4 = vpop.f32.mrf.mxu1  ;;  %2670 = vmatpush.bf16.msra.mxu2 %v4017_v12 }
 0x26e   : > { %v1993_v28 = vpop.f32.mrf.mxu2  ;;  %v1968_v38 = vpop.f32.mrf.mxu0  ;;  %v1639_v4 = vadd.f32 %v4795_v59, %v4788_v39 }
 0x26f   : > { %v1994_v5 = vadd.f32 %v1993_v28, %v1965_v56  ;;  %v1456_v56 = vadd.f32 %v4775_v18, %v4777_v14 }
 0x271   : > { %v4838_v7 = vadd.f32 %v1994_v5, %v1822_v27  ;;  %v1470_v62 = vadd.f32 %v1456_v56, %v4725_v58 }
 0x274   : > { %v2148_v61 = vpop.f32.mrf.mxu3 }
 0x275   : > { %v2120_v11 = vpop.f32.mrf.mxu1 }
 0x276   : > { %v1996_v10 = vpop.f32.mrf.mxu2  ;;  %v1970_v46 = vpop.f32.mrf.mxu0  ;;  %v2149_v24 = vadd.f32 %v2148_v61, %v2120_v11  ;;  %v1806_v61 = vadd.f32 %v4811_v22, %v4813_v8  ;;  %v4025_v22 = vld [vmem:[%s5080_s5 + $0x88] sm:$0xff]  ;;  %v4022_v8 = vld [vmem:[%s5080_s5 + $0x70] sm:$0xff] }
 0x277   : > { %v1997_v15 = vadd.f32 %v1996_v10, %v1968_v38  ;;  %v1989_v46 = vadd.f32 %v4834_v33, %v4820_v52  ;;  %v4031_v52 = vld [vmem:[%s5080_s5 + $0xb8] sm:$0xff]  ;;  %2739 = vmatpush.bf16.msrb.mxu1 %v4022_v8  ;;  %2818 = vmatpush.bf16.msrb.mxu3 %v4025_v22 }
 0x278   : > { %v2167_v55 = vadd.f32 %v2149_v24, %v4809_v0  ;;  %2968 = vmatpush.bf16.msrb.mxu2 %v4031_v52 }
 0x279   : > { %v4849_v43 = vadd.f32 %v1997_v15, %v1823_v41  ;;  %v1653_v15 = vadd.f32 %v1639_v4, %v1470_v62 }
 0x27b   : > { %v1820_v34 = vadd.f32 %v1806_v61, %v1653_v15  ;;  %2740 = vmatpush.bf16.msrb.mxu1 %v4021_v17  ;;  %v4029_v17 = vld [vmem:[%s5080_s5 + $0xa8] sm:$0xff] }
 0x27c   : > { %v2150_v36 = vpop.f32.mrf.mxu3 }
 0x27d   : > { %v2122_v30 = vpop.f32.mrf.mxu1 }
 0x27e   : > { %v1998_v26 = vpop.f32.mrf.mxu2  ;;  %v2303_v37 = vpop.f32.mrf.mxu0  ;;  %v2151_v60 = vadd.f32 %v2150_v36, %v2122_v30 }
 0x280   : > { %v2168_v45 = vadd.f32 %v2151_v60, %v2001_v44  ;;  %v4030_v60 = vld [vmem:[%s5080_s5 + $0xb0] sm:$0xff]  ;;  %v4023_v44 = vld [vmem:[%s5080_s5 + $0x78] sm:$0xff] }
 0x281   : > { %2969 = vmatpush.bf16.msrb.mxu2 %v4030_v60  ;;  %v4026_v60 = vld [vmem:[%s5080_s5 + $0x90] sm:$0xff] }
 0x282   : > { %2891 = vmatpush.bf16.msrb.mxu0 %v4026_v60 }
 0x284   : > { %v2153_v51 = vpop.f32.mrf.mxu3 }
 0x285   : > { %v2125_v21 = vpop.f32.mrf.mxu1  ;;  %2970 = vmatpush.bf16.msrb.mxu2 %v4029_v17 }
 0x286   : > { %v2331_v50 = vpop.f32.mrf.mxu2  ;;  %v2305_v2 = vpop.f32.mrf.mxu0  ;;  %v2154_v41 = vadd.f32 %v2153_v51, %v2125_v21 }
 0x287   : > { %v2332_v57 = vadd.f32 %v2331_v50, %v2303_v37 }
 0x288   : > { %v2169_v11 = vadd.f32 %v2154_v41, %v4822_v16  ;;  %v2003_v16 = vadd.f32 %v1989_v46, %v1820_v34 }
 0x289   : > { %v2350_v19 = vadd.f32 %v2332_v57, %v2167_v55  ;;  %v4024_v55 = vld [vmem:[%s5080_s5 + $0x80] sm:$0xff] }
 0x28a   : > { %2819 = vmatpush.bf16.msrb.mxu3 %v4024_v55 }
 0x28b   : > { %v2361_v0 = vadd.f32 %v4870_v9, %v2350_v19 }
 0x28c   : > { %v2155_v47 = vpop.f32.mrf.mxu3 }
 0x28d   : > { %v2127_v25 = vpop.f32.mrf.mxu1  ;;  %v2368_v23 = vmax.f32 %v2361_v0, 0.0 }
 0x28e   : > { %v2333_v27 = vpop.f32.mrf.mxu2  ;;  %v2308_v63 = vpop.f32.mrf.mxu0  ;;  %v2156_v58 = vadd.f32 %v2155_v47, %v2127_v25  ;;  %2820 = vmatpush.bf16.msrb.mxu3 %v4023_v44 }
 0x28f   : > { %v2334_v20 = vadd.f32 %v2333_v27, %v2305_v2  ;;  %v2375_v28 = vpack.c.bf16 %v2368_v23, %v2368_v23 }
 0x290   : > { %v2170_v40 = vadd.f32 %v2156_v58, %v2003_v16 }
 0x291   : > { %v2351_v3 = vadd.f32 %v2334_v20, %v2168_v45  ;;  %v2402_v39 = vunpack.c.l.b16 %v2375_v28 }
 0x293   : > { %v2362_v31 = vadd.f32 %v4870_v9, %v2351_v3 }
 0x294   : > { %v2158_v38 = vpop.f32.mrf.mxu3 }
 0x295   : > { %v2369_v5 = vmax.f32 %v2362_v31, 0.0  ;;  %v2130_v6 = vpop.f32.mrf.mxu1 }
 0x296   : > { %v2336_v32 = vpop.f32.mrf.mxu2  ;;  %v2310_v14 = vpop.f32.mrf.mxu0  ;;  %v2159_v50 = vadd.f32 %v2158_v38, %v2130_v6 }
 0x297   : > { %v2376_v10 = vpack.c.bf16 %v2369_v5, %v2369_v5  ;;  %v2337_v18 = vadd.f32 %v2336_v32, %v2308_v63 }
 0x298   : > { %v2171_v0 = vadd.f32 %v2159_v50, %v4836_v35 }
 0x299   : > { %v2403_v59 = vunpack.c.l.b16 %v2376_v10  ;;  %v2352_v42 = vadd.f32 %v2337_v18, %v2169_v11 }
 0x29b   : > { %v4893_v36 = vpack.c.b16 %v2403_v59, %v2402_v39  ;;  %v2363_v33 = vadd.f32 %v4870_v9, %v2352_v42 }
 0x29c   : > { %v2160_v30 = vpop.f32.mrf.mxu3 }
 0x29d   : > { %3753 = vmatmul.msk.bf16.vlgmr.msra.gmra.mxu3 %vm2459_vm10, %v4893_v36  ;;  %v2132_v26 = vpop.f32.mrf.mxu1  ;;  %v2370_v51 = vmax.f32 %v2363_v33, 0.0  ;;  %v4915_v57 = vshrl.u32 %v4893_v36, 16  ;;  %v4918_v2 = vshll.u32 %v4893_v36, 16  ;;  %v2548_v28 = vrot.slane %v4893_v36, 1 }
 0x29e   : > { %v2338_v37 = vpop.f32.mrf.mxu2  ;;  %v2313_v48 = vpop.f32.mrf.mxu0  ;;  %v2161_v45 = vadd.f32 %v2160_v30, %v2132_v26  ;;  %v2850_v5 = vrot.slane %v4893_v36, 3  ;;  %v2700_v32 = vrot.slane %v4893_v36, 2 }
 0x29f   : > { %v2339_v24 = vadd.f32 %v2338_v37, %v2310_v14  ;;  %v2377_v54 = vpack.c.bf16 %v2370_v51, %v2370_v51  ;;  %v2418_v20 = vrot.slane %v4918_v2, 1  ;;  %v2619_v63 = vrot.slane %v4915_v57, 1 }
 0x2a0   : > { %v2620_v23 = vrot.slane %v4918_v2, 2  ;;  %v2771_v31 = vrot.slane %v4915_v57, 2  ;;  %v2772_v35 = vrot.slane %v4918_v2, 3  ;;  %v2172_v38 = vadd.f32 %v2161_v45, %v4838_v7 }
 0x2a1   : > { %v2353_v21 = vadd.f32 %v2339_v24, %v2170_v40  ;;  %v2404_v3 = vunpack.c.l.b16 %v2377_v54  ;;  %v2419_v62 = vor.u32 %v2418_v20, %v4915_v57  ;;  %v2921_v42 = vrot.slane %v4915_v57, 3 }
 0x2a2   : > { %v2621_v6 = vor.u32 %v2620_v23, %v2619_v63  ;;  %v2773_v7 = vor.u32 %v2772_v35, %v2771_v31  ;;  %v2922_v8 = vrot.slane %v4918_v2, 4 }
 0x2a3   : > { %v2364_v29 = vadd.f32 %v4870_v9, %v2353_v21 }
 0x2a4   : > { %v2163_v19 = vpop.f32.mrf.mxu3  ;;  %v2923_v13 = vor.u32 %v2922_v8, %v2921_v42 }
 0x2a5   : > { %v2371_v1 = vmax.f32 %v2364_v29, 0.0  ;;  %v2135_v12 = vpop.f32.mrf.mxu1 }
 0x2a6   : > { %v2341_v49 = vpop.f32.mrf.mxu2  ;;  %v2315_v27 = vpop.f32.mrf.mxu0  ;;  %v2164_v26 = vadd.f32 %v2163_v19, %v2135_v12  ;;  %v4020_v19 = vld [vmem:[%s5080_s5 + $0x60] sm:$0xff] }
 0x2a7   : > { %v2378_v47 = vpack.c.bf16 %v2371_v1, %v2371_v1  ;;  %v2342_v25 = vadd.f32 %v2341_v49, %v2313_v48  ;;  %2741 = vmatpush.bf16.msrb.mxu1 %v4020_v19 }
 0x2a8   : > { %v2173_v49 = vadd.f32 %v2164_v26, %v4849_v43 }
 0x2a9   : > { %v2405_v56 = vunpack.c.l.b16 %v2378_v47  ;;  %v2354_v41 = vadd.f32 %v2342_v25, %v2171_v0 }
 0x2ab   : > { %v4938_v4 = vpack.c.b16 %v2405_v56, %v2404_v3  ;;  %v2365_v61 = vadd.f32 %v4870_v9, %v2354_v41 }
 0x2ac   : > { %v2165_v14 = vpop.f32.mrf.mxu3 }
 0x2ad   : > { %3754 = vmatmul.msk.bf16.gmra.mxu3 %vm2459_vm10, %v4938_v4  ;;  %v2549_v11 = vrot.slane %v4938_v4, 1  ;;  %v2421_v10 = vshll.u32 %v4938_v4, 16  ;;  %v2425_v18 = vshrl.u32 %v4938_v4, 16  ;;  %v2137_v46 = vpop.f32.mrf.mxu1  ;;  %v2851_v39 = vrot.slane %v4938_v4, 3 }
 0x2ae   : > { %v2343_v15 = vpop.f32.mrf.mxu2  ;;  %v2701_v59 = vrot.slane %v4938_v4, 2  ;;  %v2318_v22 = vpop.f32.mrf.mxu0  ;;  %v2372_v37 = vmax.f32 %v2365_v61, 0.0 }
 0x2af   : > { %v2344_v34 = vadd.f32 %v2343_v15, %v2315_v27  ;;  %v2550_v58 = vsel %vm1326_vm4, %v2548_v28, %v2549_v11  ;;  %v2423_v36 = vrot.slane %v2421_v10, 1  ;;  %v2622_v52 = vrot.slane %v2425_v18, 1 }
 0x2b0   : > { %3774 = vmatmul.msk.bf16.vlgmr.msra.gmra.mxu0 %vm2459_vm10, %v2550_v58  ;;  %v2623_v16 = vrot.slane %v2421_v10, 2  ;;  %v2774_v33 = vrot.slane %v2425_v18, 2  ;;  %v2775_v30 = vrot.slane %v2421_v10, 3  ;;  %v4964_v21 = vsel %vm2026_vm8, %v2850_v5, %v2851_v39 }
 0x2b1   : > { %v2355_v40 = vadd.f32 %v2344_v34, %v2172_v38  ;;  %v2424_v24 = vsel %vm993_vm3, %v2419_v62, %v2423_v36  ;;  %v4969_v50 = vsel %vm1676_vm6, %v2700_v32, %v2701_v59  ;;  %v2924_v53 = vrot.slane %v2425_v18, 3 }
 0x2b2   : > { %3738 = vmatmul.msk.bf16.vlgmr.msra.gmra.mxu1 %vm2459_vm10, %v2424_v24  ;;  %v2624_v48 = vor.u32 %v2623_v16, %v2622_v52  ;;  %v2776_v51 = vor.u32 %v2775_v30, %v2774_v33  ;;  %v2925_v55 = vrot.slane %v2421_v10, 4  ;;  %v2379_v54 = vpack.c.bf16 %v2372_v37, %v2372_v37 }
 0x2b3   : > { %v2366_v29 = vadd.f32 %v4870_v9, %v2355_v40  ;;  %v2427_v28 = vor.u32 %v2425_v18, %v2423_v36 }
 0x2b4   : > { %v2625_v57 = vsel %vm1493_vm5, %v2621_v6, %v2624_v48  ;;  %v4974_v2 = vsel %vm1843_vm7, %v2773_v7, %v2776_v51  ;;  %v2926_v12 = vor.u32 %v2925_v55, %v2924_v53  ;;  %v2406_v45 = vunpack.c.l.b16 %v2379_v54 }
 0x2b5   : > { %v2373_v1 = vmax.f32 %v2366_v29, 0.0  ;;  %3795 = vmatmul.msk.bf16.vlgmr.msra.gmra.mxu2 %vm2459_vm10, %v2625_v57 }
 0x2b6   : > { %v2346_v44 = vpop.f32.mrf.mxu2  ;;  %v2320_v25 = vpop.f32.mrf.mxu0  ;;  %v4988_v27 = vsel %vm2193_vm9, %v2923_v13, %v2926_v12 }
 0x2b7   : > { %v2380_v0 = vpack.c.bf16 %v2373_v1, %v2373_v1  ;;  %v2347_v47 = vadd.f32 %v2346_v44, %v2318_v22 }
 0x2b9   : > { %v2407_v20 = vunpack.c.l.b16 %v2380_v0  ;;  %v2356_v63 = vadd.f32 %v2347_v47, %v2173_v49 }
 0x2bb   : > { %v2411_v23 = vpack.c.b16 %v2407_v20, %v2406_v45  ;;  %v2367_v3 = vadd.f32 %v4870_v9, %v2356_v63 }
 0x2bd   : > { %v2374_v56 = vmax.f32 %v2367_v3, 0.0  ;;  %3755 = vmatmul.msk.bf16.gmra.mxu3 %vm2459_vm10, %v2411_v23  ;;  %v2551_v43 = vrot.slane %v2411_v23, 1  ;;  %v2429_v41 = vshll.u32 %v2411_v23, 16  ;;  %v2433_v31 = vshrl.u32 %v2411_v23, 16 }
 0x2be   : > { %v2348_v35 = vpop.f32.mrf.mxu2  ;;  %v2853_v5 = vrot.slane %v2411_v23, 3  ;;  %v2703_v38 = vrot.slane %v2411_v23, 2 }
 0x2bf   : > { %v2381_v62 = vpack.c.bf16 %v2374_v56, %v2374_v56  ;;  %v2552_v6 = vsel %vm1326_vm4, %v2549_v11, %v2551_v43  ;;  %v2431_v32 = vrot.slane %v2429_v41, 1  ;;  %v2626_v61 = vrot.slane %v2433_v31, 1 }
 0x2c0   : > { %3775 = vmatmul.msk.bf16.gmra.mxu0 %vm2459_vm10, %v2552_v6  ;;  %v2627_v9 = vrot.slane %v2429_v41, 2  ;;  %v2778_v10 = vrot.slane %v2433_v31, 2  ;;  %v2779_v14 = vrot.slane %v2429_v41, 3  ;;  %v2854_v15 = vsel %vm2026_vm8, %v2851_v39, %v2853_v5 }
 0x2c1   : > { %v2408_v46 = vunpack.c.l.b16 %v2381_v62  ;;  %v2432_v18 = vsel %vm993_vm3, %v2427_v28, %v2431_v32  ;;  %v2704_v7 = vsel %vm1676_vm6, %v2701_v59, %v2703_v38  ;;  %v2928_v34 = vrot.slane %v2433_v31, 3 }
 0x2c2   : > { %3739 = vmatmul.msk.bf16.gmra.mxu1 %vm2459_vm10, %v2432_v18  ;;  %v2628_v11 = vor.u32 %v2627_v9, %v2626_v61  ;;  %v2780_v42 = vor.u32 %v2779_v14, %v2778_v10  ;;  %v2929_v58 = vrot.slane %v2429_v41, 4  ;;  %v2435_v30 = vor.u32 %v2433_v31, %v2431_v32 }
 0x2c3   : > { %v2412_v36 = vpack.c.b16 %v2408_v46, %v2408_v46 }
 0x2c4   : > { %v2629_v22 = vsel %vm1493_vm5, %v2624_v48, %v2628_v11  ;;  %v2781_v8 = vsel %vm1843_vm7, %v2776_v51, %v2780_v42  ;;  %v2930_v52 = vor.u32 %v2929_v58, %v2928_v34 }
 0x2c5   : > { %3796 = vmatmul.msk.bf16.gmra.mxu2 %vm2459_vm10, %v2629_v22  ;;  %v2553_v39 = vrot.slane %v2412_v36, 1  ;;  %v2437_v16 = vshll.u32 %v2412_v36, 16  ;;  %v2630_v33 = vshrl.u32 %v2412_v36, 16  ;;  %v2855_v4 = vrot.slane %v2412_v36, 3 }
 0x2c6   : > { %v2931_v59 = vsel %vm2193_vm9, %v2926_v12, %v2930_v52  ;;  %v2705_v26 = vrot.slane %v2412_v36, 2 }
 0x2c7   : > { %v2554_v37 = vsel %vm1326_vm4, %v2551_v43, %v2553_v39  ;;  %v2439_v40 = vrot.slane %v2437_v16, 1  ;;  %v2632_v24 = vrot.slane %v2630_v33, 1  ;;  %v2633_v29 = vrot.slane %v2437_v16, 2 }
 0x2c8   : > { %v2782_v53 = vrot.slane %v2630_v33, 2  ;;  %v2783_v48 = vrot.slane %v2437_v16, 3  ;;  %v2856_v51 = vsel %vm2026_vm8, %v2853_v5, %v2855_v4  ;;  %v2706_v55 = vsel %vm1676_vm6, %v2703_v38, %v2705_v26 }
 0x2c9   : > { %v2440_v57 = vsel %vm993_vm3, %v2435_v30, %v2439_v40  ;;  %v2634_v54 = vor.u32 %v2633_v29, %v2632_v24  ;;  %v2932_v1 = vrot.slane %v2630_v33, 3  ;;  %v2933_v19 = vrot.slane %v2437_v16, 4 }
 0x2ca   : > { %v2784_v17 = vor.u32 %v2783_v48, %v2782_v53 }
 0x2cb   : > { %v2635_v60 = vsel %vm1493_vm5, %v2628_v11, %v2634_v54  ;;  %v2934_v13 = vor.u32 %v2933_v19, %v2932_v1 }
 0x2cc   : > { %v2785_v12 = vsel %vm1843_vm7, %v2780_v42, %v2784_v17 }
 0x2cd   : > { %3837 = vmatmul.msk.bf16.vlgmr.msrb.gmra.mxu3 %vm2459_vm10, %v4974_v2  ;;  %v2935_v49 = vsel %vm2193_vm9, %v2930_v52, %v2934_v13  ;;  %v5039_v52 = vld [vmem:[%s5081_s6] ss:$0 sm:$0xff] }
 0x2d0   : > { %3776 = vmatmul.msk.bf16.gmra.mxu0 %vm2459_vm10, %v2554_v37 }
 0x2d2   : > { %3740 = vmatmul.msk.bf16.gmra.mxu1 %vm2459_vm10, %v2440_v57 }
 0x2d5   : > { %3797 = vmatmul.msk.bf16.gmra.mxu2 %vm2459_vm10, %v2635_v60 }
 0x2dd   : > { %3838 = vmatmul.msk.bf16.gmra.mxu3 %vm2459_vm10, %v2781_v8 }
 0x2e0   : > { %3858 = vmatmul.msk.bf16.vlgmr.msrb.gmra.mxu0 %vm2459_vm10, %v4964_v21 }
 0x2e2   : > { %3816 = vmatmul.msk.bf16.vlgmr.msrb.gmra.mxu1 %vm2459_vm10, %v4969_v50 }
 0x2e5   : > { %3879 = vmatmul.msk.bf16.vlgmr.msrb.gmra.mxu2 %vm2459_vm10, %v4988_v27 }
 0x2ed   : > { %3839 = vmatmul.msk.bf16.gmra.mxu3 %vm2459_vm10, %v2785_v12 }
 0x2f0   : > { %3859 = vmatmul.msk.bf16.gmra.mxu0 %vm2459_vm10, %v2854_v15 }
 0x2f2   : > { %3817 = vmatmul.msk.bf16.gmra.mxu1 %vm2459_vm10, %v2704_v7 }
 0x2f5   : > { %3880 = vmatmul.msk.bf16.gmra.mxu2 %vm2459_vm10, %v2931_v59 }
 0x300   : > { %3860 = vmatmul.msk.bf16.gmra.mxu0 %vm2459_vm10, %v2856_v51 }
 0x302   : > { %3818 = vmatmul.msk.bf16.gmra.mxu1 %vm2459_vm10, %v2706_v55 }
 0x305   : > { %3881 = vmatmul.msk.bf16.gmra.mxu2 %vm2459_vm10, %v2935_v49 }
 0x320   : > { %v2526_v21 = vpop.f32.mrf.mxu3 }
 0x328   : > { %v2528_v2 = vpop.f32.mrf.mxu3 }
 0x32d   : > { %v2591_v50 = vpop.f32.mrf.mxu0 }
 0x32f   : > { %v2478_v44 = vpop.f32.mrf.mxu1 }
 0x330   : > { %v2531_v0 = vpop.f32.mrf.mxu3  ;;  %v2527_v6 = vadd.f32 %v2526_v21, %v2478_v44 }
 0x332   : > { %v2606_v9 = vadd.f32 %v2591_v50, %v2527_v6 }
 0x335   : > { %v2593_v47 = vpop.f32.mrf.mxu0 }
 0x337   : > { %v2480_v25 = vpop.f32.mrf.mxu1 }
 0x338   : > { %v2672_v27 = vpop.f32.mrf.mxu2  ;;  %v2533_v45 = vpop.f32.mrf.mxu3  ;;  %v2529_v46 = vadd.f32 %v2528_v2, %v2480_v25 }
 0x339   : > { %v2687_v14 = vadd.f32 %v2672_v27, %v2606_v9 }
 0x33a   : > { %v2607_v34 = vadd.f32 %v2593_v47, %v2529_v46 }
 0x33d   : > { %v2596_v20 = vpop.f32.mrf.mxu0 }
 0x33f   : > { %v2483_v63 = vpop.f32.mrf.mxu1 }
 0x340   : > { %v2674_v23 = vpop.f32.mrf.mxu2  ;;  %v2536_v3 = vpop.f32.mrf.mxu3  ;;  %v2532_v39 = vadd.f32 %v2531_v0, %v2483_v63 }
 0x341   : > { %v2688_v58 = vadd.f32 %v2674_v23, %v2607_v34 }
 0x342   : > { %v2608_v26 = vadd.f32 %v2596_v20, %v2532_v39 }
 0x345   : > { %v2598_v56 = vpop.f32.mrf.mxu0 }
 0x347   : > { %v2485_v43 = vpop.f32.mrf.mxu1 }
 0x348   : > { %v2677_v41 = vpop.f32.mrf.mxu2  ;;  %v2538_v35 = vpop.f32.mrf.mxu3  ;;  %v2534_v53 = vadd.f32 %v2533_v45, %v2485_v43 }
 0x349   : > { %v2689_v40 = vadd.f32 %v2677_v41, %v2608_v26 }
 0x34a   : > { %v2609_v19 = vadd.f32 %v2598_v56, %v2534_v53 }
 0x34d   : > { %v2601_v31 = vpop.f32.mrf.mxu0 }
 0x34f   : > { %v2488_v28 = vpop.f32.mrf.mxu1 }
 0x350   : > { %v2679_v5 = vpop.f32.mrf.mxu2  ;;  %v2822_v32 = vpop.f32.mrf.mxu3  ;;  %v2537_v49 = vadd.f32 %v2536_v3, %v2488_v28 }
 0x351   : > { %v2690_v17 = vadd.f32 %v2679_v5, %v2609_v19 }
 0x352   : > { %v2610_v25 = vadd.f32 %v2601_v31, %v2537_v49 }
 0x355   : > { %v5034_v38 = vpop.f32.mrf.mxu0 }
 0x357   : > { %v2490_v62 = vpop.f32.mrf.mxu1 }
 0x358   : > { %v2682_v61 = vpop.f32.mrf.mxu2  ;;  %v2824_v11 = vpop.f32.mrf.mxu3  ;;  %v2539_v63 = vadd.f32 %v2538_v35, %v2490_v62 }
 0x359   : > { %v2691_v27 = vadd.f32 %v2682_v61, %v2610_v25 }
 0x35a   : > { %v2611_v5 = vadd.f32 %v5034_v38, %v2539_v63 }
 0x35d   : > { %v2893_v10 = vpop.f32.mrf.mxu0 }
 0x35f   : > { %v2743_v15 = vpop.f32.mrf.mxu1 }
 0x360   : > { %v2684_v18 = vpop.f32.mrf.mxu2  ;;  %v2758_v7 = vadd.f32 %v2743_v15, %v2687_v14  ;;  %v2827_v37 = vpop.f32.mrf.mxu3 }
 0x361   : > { %v2692_v31 = vadd.f32 %v2684_v18, %v2611_v5 }
 0x362   : > { %v2837_v42 = vadd.f32 %v2822_v32, %v2758_v7 }
 0x364   : > { %v2908_v8 = vadd.f32 %v2893_v10, %v2837_v42 }
 0x365   : > { %v2895_v36 = vpop.f32.mrf.mxu0 }
 0x367   : > { %v2745_v22 = vpop.f32.mrf.mxu1 }
 0x368   : > { %v2759_v16 = vadd.f32 %v2745_v22, %v2688_v58  ;;  %v2972_v33 = vpop.f32.mrf.mxu2  ;;  %v2829_v60 = vpop.f32.mrf.mxu3 }
 0x369   : > { %v2987_v4 = vadd.f32 %v2972_v33, %v2908_v8 }
 0x36a   : > { %v2838_v30 = vadd.f32 %v2824_v11, %v2759_v16 }
 0x36b   : > { %v2997_v59 = vadd.f32 %v5039_v52, %v2987_v4 }
 0x36c   : > { %v2909_v29 = vadd.f32 %v2895_v36, %v2838_v30 }
 0x36d   : > { %3004 = vst.msk [vmem:[%s5082_s7] sm:$0xff] %vm3003_vm11, %v2997_v59  ;;  %v2898_v48 = vpop.f32.mrf.mxu0 }
 0x36f   : > { %v2748_v24 = vpop.f32.mrf.mxu1 }
 0x370   : > { %v2760_v51 = vadd.f32 %v2748_v24, %v2689_v40  ;;  %v2974_v55 = vpop.f32.mrf.mxu2  ;;  %v2832_v23 = vpop.f32.mrf.mxu3 }
 0x371   : > { %v2988_v57 = vadd.f32 %v2974_v55, %v2909_v29 }
 0x372   : > { %v2839_v54 = vadd.f32 %v2827_v37, %v2760_v51 }
 0x373   : > { %v2998_v1 = vadd.f32 %v5039_v52, %v2988_v57 }
 0x374   : > { %v2910_v12 = vadd.f32 %v2898_v48, %v2839_v54 }
 0x375   : > { %3005 = vst.msk [vmem:[%s5082_s7 + $0x8] sm:$0xff] %vm3003_vm11, %v2998_v1  ;;  %v2900_v44 = vpop.f32.mrf.mxu0 }
 0x377   : > { %v2750_v13 = vpop.f32.mrf.mxu1 }
 0x378   : > { %v2761_v21 = vadd.f32 %v2750_v13, %v2690_v17  ;;  %v2977_v2 = vpop.f32.mrf.mxu2  ;;  %v2834_v10 = vpop.f32.mrf.mxu3 }
 0x379   : > { %v2989_v50 = vadd.f32 %v2977_v2, %v2910_v12 }
 0x37a   : > { %v2840_v0 = vadd.f32 %v2829_v60, %v2761_v21 }
 0x37b   : > { %v2999_v47 = vadd.f32 %v5039_v52, %v2989_v50 }
 0x37c   : > { %v2911_v20 = vadd.f32 %v2900_v44, %v2840_v0 }
 0x37d   : > { %3006 = vst.msk [vmem:[%s5082_s7 + $0x10] sm:$0xff] %vm3003_vm11, %v2999_v47  ;;  %v2903_v6 = vpop.f32.mrf.mxu0 }
 0x37f   : > { %v2753_v45 = vpop.f32.mrf.mxu1 }
 0x380   : > { %v2762_v56 = vadd.f32 %v2753_v45, %v2691_v27  ;;  %v2979_v3 = vpop.f32.mrf.mxu2 }
 0x381   : > { %v2990_v43 = vadd.f32 %v2979_v3, %v2911_v20 }
 0x382   : > { %v2841_v41 = vadd.f32 %v2832_v23, %v2762_v56 }
 0x383   : > { %v3000_v28 = vadd.f32 %v5039_v52, %v2990_v43 }
 0x384   : > { %v2912_v61 = vadd.f32 %v2903_v6, %v2841_v41 }
 0x385   : > { %3007 = vst.msk [vmem:[%s5082_s7 + $0x18] sm:$0xff] %vm3003_vm11, %v3000_v28  ;;  %v2905_v38 = vpop.f32.mrf.mxu0 }
 0x387   : > { %v2755_v32 = vpop.f32.mrf.mxu1 }
 0x388   : > { %v2763_v9 = vadd.f32 %v2755_v32, %v2692_v31  ;;  %v2982_v35 = vpop.f32.mrf.mxu2 }
 0x389   : > { %v2991_v62 = vadd.f32 %v2982_v35, %v2912_v61 }
 0x38a   : > { %v2842_v14 = vadd.f32 %v2834_v10, %v2763_v9 }
 0x38b   : > { %v3001_v15 = vadd.f32 %v5039_v52, %v2991_v62 }
 0x38c   : > { %v2913_v46 = vadd.f32 %v2905_v38, %v2842_v14 }
 0x38d   : > { %3008 = vst.msk [vmem:[%s5082_s7 + $0x20] sm:$0xff] %vm3003_vm11, %v3001_v15 }
 0x390   : > { %v2984_v7 = vpop.f32.mrf.mxu2 }
 0x391   : > { %v2992_v11 = vadd.f32 %v2984_v7, %v2913_v46 }
 0x393   : > { %v3002_v18 = vadd.f32 %v5039_v52, %v2992_v11 }
 0x395   : > { %3009 = vst.msk [vmem:[%s5082_s7 + $0x28] sm:$0xff] %vm3003_vm11, %v3002_v18 }
 0x396 PF: > { %s17_s24 = sadd.s32 1, %s4063_s24  }
 0x397   : > { %p14_p6 = scmp.ge.s32.totalorder %s17_s24, 10  }
 0x399   :  { %16 = sbr.rel (!%p14_p6) target bundleno = 1 (0x1), region = 99 }

</bundles_post_ra>
